<compile_context>
chip_gen: v6e
topology: v6e:2x2x1
jax: 0.10.0
libtpu: 0.0.40
codegen_flags: <defaults>
</compile_context>

<pallas_src>
import jax
import jax.numpy as jnp
from jax.experimental import pallas as pl
from jax.experimental.pallas import tpu as pltpu

# Logical (PyTorch) sizes
D_IN = 32          # X.shape[1] analogue (small synthetic)
H1, H2, N_CLS = 300, 150, 9
# Lane-aligned (padded) sizes used inside the kernel
H1P, H2P, NCP = 384, 256, 128
EPS = 1e-5
NEG_BIG = -1e30


def _mlp_kernel(x_ref,
                w1_ref, g1_ref, be1_ref,
                w2_ref, g2_ref, be2_ref,
                w3_ref, b3_ref,
                o_ref):
    inv_b = 1.0 / x_ref.shape[0]          # static Python float

    # ---- fc1: bf16 operands (x pre-cast), f32 accumulation on the MXU ----
    # Linear bias omitted: exactly cancelled by BN1's batch-mean subtraction.
    h = jnp.dot(x_ref[...], w1_ref[...], preferred_element_type=jnp.float32)

    # ---- batchnorm1 (training-mode batch stats), one-pass moments ----
    # g1/be1 were pre-scaled by 0.5 at prep time (inner sigmoid constant).
    s1 = jnp.sum(h, axis=0, keepdims=True)
    ss1 = jnp.sum(h * h, axis=0, keepdims=True)
    mu1 = s1 * inv_b
    var1 = jnp.maximum(ss1 * inv_b - mu1 * mu1, 0.0)
    scale1 = g1_ref[...] * jax.lax.rsqrt(var1 + EPS)
    shift1 = be1_ref[...] - mu1 * scale1
    h = h * scale1 + shift1               # = 0.5 * BN1(fc1(x))

    # ---- sigmoid: only tanh survives (outer 0.5*(t+1) folded into W2/BN2) ----
    t = jnp.tanh(h.astype(jnp.bfloat16))

    # ---- fc2 with W2' = 0.5*W2 (bias + sigmoid constant cancelled by BN2) ----
    h2 = jnp.dot(t, w2_ref[...], preferred_element_type=jnp.float32)

    # ---- batchnorm2, one-pass moments ----
    s2 = jnp.sum(h2, axis=0, keepdims=True)
    ss2 = jnp.sum(h2 * h2, axis=0, keepdims=True)
    mu2 = s2 * inv_b
    var2 = jnp.maximum(ss2 * inv_b - mu2 * mu2, 0.0)
    scale2 = g2_ref[...] * jax.lax.rsqrt(var2 + EPS)
    shift2 = be2_ref[...] - mu2 * scale2
    h2 = h2 * scale2 + shift2

    # ---- relu in bf16, straight into fc3 ----
    r = jnp.maximum(h2.astype(jnp.bfloat16), 0.0)

    # ---- fc3 (128 lane-dense output columns) ----
    logits = jnp.dot(r, w3_ref[...],
                     preferred_element_type=jnp.float32) + b3_ref[...]

    # mask padded class columns so they do not contribute to softmax
    col = jax.lax.broadcasted_iota(jnp.int32, logits.shape, 1)
    logits = jnp.where(col < N_CLS, logits, NEG_BIG)

    # ---- softmax over classes (exact reciprocal: it's one (B,1) vreg) ----
    m = jnp.max(logits, axis=-1, keepdims=True)
    e = jnp.exp(logits - m)
    denom = jnp.sum(e, axis=-1, keepdims=True)
    o_ref[...] = (e * pl.reciprocal(denom, approx=False)).astype(o_ref.dtype)


def prepare_params(params):
    """One-time prep: zero-pad to lane-aligned widths, cast matmul weights to
    bf16, fold sigmoid constants into BN1 gamma/beta and W2, drop the fc1/fc2
    biases (exactly cancelled by training-mode BatchNorm mean subtraction)."""
    (w1, b1, g1, be1, w2, b2, g2, be2, w3, b3) = params
    del b1, b2  # cancelled exactly by BN batch-mean subtraction (training mode)

    def pad2(a, rows, cols):
        return jnp.pad(a, ((0, rows - a.shape[0]), (0, cols - a.shape[1])))

    w1p = pad2(w1, D_IN, H1P).astype(jnp.bfloat16)
    # sigmoid(z) = 0.5*(tanh(0.5*z)+1): inner 0.5 -> BN1 gamma/beta,
    # outer 0.5 -> W2 (its +0.5 column-constant is removed by BN2's mean).
    g1p = pad2(0.5 * g1, 1, H1P)
    be1p = pad2(0.5 * be1, 1, H1P)
    w2p = pad2(0.5 * w2, H1P, H2P).astype(jnp.bfloat16)
    g2p = pad2(g2, 1, H2P)
    be2p = pad2(be2, 1, H2P)
    w3p = pad2(w3, H2P, NCP).astype(jnp.bfloat16)
    b3p = pad2(b3, 1, NCP)
    return (w1p, g1p, be1p, w2p, g2p, be2p, w3p, b3p)


@jax.jit
def model_forward(x_bf16, prepared):
    """x_bf16: (B, D_IN) bf16 input; prepared: output of prepare_params()."""
    B = x_bf16.shape[0]
    args = (x_bf16,) + tuple(prepared)

    def full_spec(a):
        zeros = (0,) * a.ndim
        return pl.BlockSpec(a.shape, lambda *_, z=zeros: z)

    flops = 2 * B * (D_IN * H1P + H1P * H2P + H2P * NCP)
    transcendentals = B * (H1P + NCP + 1)          # tanh + exp + reciprocal
    bytes_accessed = (B * D_IN * 2                                   # bf16 x
                      + 2 * (D_IN * H1P + H1P * H2P + H2P * NCP)     # bf16 W
                      + 4 * (2 * H1P + 2 * H2P + NCP)                # f32 vecs
                      + 4 * B * NCP)                                 # f32 out

    out_padded = pl.pallas_call(
        _mlp_kernel,
        out_shape=jax.ShapeDtypeStruct((B, NCP), jnp.float32),
        grid=(),
        in_specs=[full_spec(a) for a in args],
        out_specs=pl.BlockSpec((B, NCP), lambda *_: (0, 0)),
        cost_estimate=pl.CostEstimate(flops=flops,
                                      transcendentals=transcendentals,
                                      bytes_accessed=bytes_accessed),
    )(*args)
    # TODO(synk): for very large B, tile the batch over a "parallel" grid axis
    # (engages v7x's second TensorCore, fills the 256-wide MXU on v6e/v7x) with
    # two-pass BatchNorm (accumulate sum/sumsq across tiles) to keep exact
    # full-batch statistics; weights then use constant-index BlockSpecs so they
    # stay resident.
    return out_padded[:, :N_CLS]


def init_params(key):
    # Deterministic init mimicking PyTorch's default Linear init
    # (uniform in +/- 1/sqrt(fan_in)); BatchNorm gamma=1, beta=0.
    ks = jax.random.split(key, 6)

    def linear(kw, kb, fan_in, fan_out):
        bound = 1.0 / jnp.sqrt(jnp.float32(fan_in))
        w = jax.random.uniform(kw, (fan_in, fan_out), jnp.float32, -bound, bound)
        b = jax.random.uniform(kb, (1, fan_out), jnp.float32, -bound, bound)
        return w, b

    w1, b1 = linear(ks[0], ks[1], D_IN, H1)
    w2, b2 = linear(ks[2], ks[3], H1, H2)
    w3, b3 = linear(ks[4], ks[5], H2, N_CLS)
    g1, be1 = jnp.ones((1, H1), jnp.float32), jnp.zeros((1, H1), jnp.float32)
    g2, be2 = jnp.ones((1, H2), jnp.float32), jnp.zeros((1, H2), jnp.float32)
    return (w1, b1, g1, be1, w2, b2, g2, be2, w3, b3)


if __name__ == "__main__":
    key = jax.random.PRNGKey(0)
    k_x, k_p = jax.random.split(key)

    B = 128   # fills MXU sublanes; whole batch is one block so BN stats are exact
    x = jax.random.normal(k_x, (B, D_IN), jnp.float32)
    params = init_params(k_p)

    # One-time prep outside the per-call path.
    prepared = prepare_params(params)
    x_bf16 = x.astype(jnp.bfloat16)

    out = model_forward(x_bf16, prepared)
    out = jax.block_until_ready(out)

    assert out.shape == (B, N_CLS)
    assert bool(jnp.all(jnp.isfinite(out)))
    # exact reciprocal -> rows sum to 1 within f32 noise
    assert bool(jnp.allclose(jnp.sum(out, axis=-1), 1.0, atol=2e-3))
    assert bool(jnp.all(out >= 0.0)) and bool(jnp.all(out <= 1.0 + 1e-3))
    print("KERNEL_OK")
</pallas_src>

<mosaic_0001>
module attributes {stable_mosaic.version = 11 : i64} {
  func.func @_mlp_kernel(%arg0: memref<128x32xbf16, #tpu.memory_space<vmem>>, %arg1: memref<32x384xbf16, #tpu.memory_space<vmem>>, %arg2: memref<1x384xf32, #tpu.memory_space<vmem>>, %arg3: memref<1x384xf32, #tpu.memory_space<vmem>>, %arg4: memref<384x256xbf16, #tpu.memory_space<vmem>>, %arg5: memref<1x256xf32, #tpu.memory_space<vmem>>, %arg6: memref<1x256xf32, #tpu.memory_space<vmem>>, %arg7: memref<256x128xbf16, #tpu.memory_space<vmem>>, %arg8: memref<1x128xf32, #tpu.memory_space<vmem>>, %arg9: memref<128x128xf32, #tpu.memory_space<vmem>>) attributes {dimension_semantics = [], scalar_prefetch = 0 : i64, scratch_operands = 0 : i64, tpu.core_type = #tpu.core_type<tc>} {
    %c0 = arith.constant 0 : index
    %c0_0 = arith.constant 0 : index
    %0 = vector.load %arg0[%c0, %c0_0] : memref<128x32xbf16, #tpu.memory_space<vmem>>, vector<128x32xbf16>
    %c0_1 = arith.constant 0 : index
    %c0_2 = arith.constant 0 : index
    %1 = vector.load %arg1[%c0_1, %c0_2] : memref<32x384xbf16, #tpu.memory_space<vmem>>, vector<32x384xbf16>
    %cst = arith.constant dense<0.000000e+00> : vector<128x384xf32>
    %2 = tpu.matmul %0, %1, %cst {dimension_numbers = #tpu.dot_dimension_numbers<[1], [0], [0], [1], [0, 0, 1, 1], [], []>} : vector<128x32xbf16>, vector<32x384xbf16>, vector<128x384xf32> -> vector<128x384xf32>
    %cst_3 = arith.constant dense<0.000000e+00> : vector<384xf32>
    %3 = vector.multi_reduction <add>, %2, %cst_3 [0] : vector<128x384xf32> to vector<384xf32>
    %4 = vector.shape_cast %3 : vector<384xf32> to vector<1x384xf32>
    %5 = arith.mulf %2, %2 : vector<128x384xf32>
    %cst_4 = arith.constant dense<0.000000e+00> : vector<384xf32>
    %6 = vector.multi_reduction <add>, %5, %cst_4 [0] : vector<128x384xf32> to vector<384xf32>
    %7 = vector.shape_cast %6 : vector<384xf32> to vector<1x384xf32>
    %cst_5 = arith.constant 7.812500e-03 : f32
    %8 = vector.broadcast %cst_5 : f32 to vector<1x384xf32>
    %9 = arith.mulf %4, %8 : vector<1x384xf32>
    %cst_6 = arith.constant 7.812500e-03 : f32
    %10 = vector.broadcast %cst_6 : f32 to vector<1x384xf32>
    %11 = arith.mulf %7, %10 : vector<1x384xf32>
    %12 = arith.mulf %9, %9 : vector<1x384xf32>
    %13 = arith.subf %11, %12 : vector<1x384xf32>
    %cst_7 = arith.constant 0.000000e+00 : f32
    %14 = vector.broadcast %cst_7 : f32 to vector<1x384xf32>
    %15 = arith.maximumf %13, %14 : vector<1x384xf32>
    %c0_8 = arith.constant 0 : index
    %c0_9 = arith.constant 0 : index
    %16 = vector.load %arg2[%c0_8, %c0_9] : memref<1x384xf32, #tpu.memory_space<vmem>>, vector<1x384xf32>
    %cst_10 = arith.constant 9.99999974E-6 : f32
    %17 = vector.broadcast %cst_10 : f32 to vector<1x384xf32>
    %18 = arith.addf %15, %17 : vector<1x384xf32>
    %19 = math.rsqrt %18 : vector<1x384xf32>
    %20 = arith.mulf %16, %19 : vector<1x384xf32>
    %c0_11 = arith.constant 0 : index
    %c0_12 = arith.constant 0 : index
    %21 = vector.load %arg3[%c0_11, %c0_12] : memref<1x384xf32, #tpu.memory_space<vmem>>, vector<1x384xf32>
    %22 = arith.mulf %9, %20 : vector<1x384xf32>
    %23 = arith.subf %21, %22 : vector<1x384xf32>
    %24 = vector.broadcast %20 : vector<1x384xf32> to vector<128x384xf32>
    %25 = arith.mulf %2, %24 : vector<128x384xf32>
    %26 = vector.broadcast %23 : vector<1x384xf32> to vector<128x384xf32>
    %27 = arith.addf %25, %26 : vector<128x384xf32>
    %28 = arith.truncf %27 : vector<128x384xf32> to vector<128x384xbf16>
    %29 = math.tanh %28 : vector<128x384xbf16>
    %c0_13 = arith.constant 0 : index
    %c0_14 = arith.constant 0 : index
    %30 = vector.load %arg4[%c0_13, %c0_14] : memref<384x256xbf16, #tpu.memory_space<vmem>>, vector<384x256xbf16>
    %cst_15 = arith.constant dense<0.000000e+00> : vector<128x256xf32>
    %31 = tpu.matmul %29, %30, %cst_15 {dimension_numbers = #tpu.dot_dimension_numbers<[1], [0], [0], [1], [0, 0, 1, 1], [], []>} : vector<128x384xbf16>, vector<384x256xbf16>, vector<128x256xf32> -> vector<128x256xf32>
    %cst_16 = arith.constant dense<0.000000e+00> : vector<256xf32>
    %32 = vector.multi_reduction <add>, %31, %cst_16 [0] : vector<128x256xf32> to vector<256xf32>
    %33 = vector.shape_cast %32 : vector<256xf32> to vector<1x256xf32>
    %34 = arith.mulf %31, %31 : vector<128x256xf32>
    %cst_17 = arith.constant dense<0.000000e+00> : vector<256xf32>
    %35 = vector.multi_reduction <add>, %34, %cst_17 [0] : vector<128x256xf32> to vector<256xf32>
    %36 = vector.shape_cast %35 : vector<256xf32> to vector<1x256xf32>
    %cst_18 = arith.constant 7.812500e-03 : f32
    %37 = vector.broadcast %cst_18 : f32 to vector<1x256xf32>
    %38 = arith.mulf %33, %37 : vector<1x256xf32>
    %cst_19 = arith.constant 7.812500e-03 : f32
    %39 = vector.broadcast %cst_19 : f32 to vector<1x256xf32>
    %40 = arith.mulf %36, %39 : vector<1x256xf32>
    %41 = arith.mulf %38, %38 : vector<1x256xf32>
    %42 = arith.subf %40, %41 : vector<1x256xf32>
    %cst_20 = arith.constant 0.000000e+00 : f32
    %43 = vector.broadcast %cst_20 : f32 to vector<1x256xf32>
    %44 = arith.maximumf %42, %43 : vector<1x256xf32>
    %c0_21 = arith.constant 0 : index
    %c0_22 = arith.constant 0 : index
    %45 = vector.load %arg5[%c0_21, %c0_22] : memref<1x256xf32, #tpu.memory_space<vmem>>, vector<1x256xf32>
    %cst_23 = arith.constant 9.99999974E-6 : f32
    %46 = vector.broadcast %cst_23 : f32 to vector<1x256xf32>
    %47 = arith.addf %44, %46 : vector<1x256xf32>
    %48 = math.rsqrt %47 : vector<1x256xf32>
    %49 = arith.mulf %45, %48 : vector<1x256xf32>
    %c0_24 = arith.constant 0 : index
    %c0_25 = arith.constant 0 : index
    %50 = vector.load %arg6[%c0_24, %c0_25] : memref<1x256xf32, #tpu.memory_space<vmem>>, vector<1x256xf32>
    %51 = arith.mulf %38, %49 : vector<1x256xf32>
    %52 = arith.subf %50, %51 : vector<1x256xf32>
    %53 = vector.broadcast %49 : vector<1x256xf32> to vector<128x256xf32>
    %54 = arith.mulf %31, %53 : vector<128x256xf32>
    %55 = vector.broadcast %52 : vector<1x256xf32> to vector<128x256xf32>
    %56 = arith.addf %54, %55 : vector<128x256xf32>
    %57 = arith.truncf %56 : vector<128x256xf32> to vector<128x256xbf16>
    %cst_26 = arith.constant 0.000000e+00 : bf16
    %58 = vector.broadcast %cst_26 : bf16 to vector<128x256xbf16>
    %59 = arith.maximumf %57, %58 : vector<128x256xbf16>
    %c0_27 = arith.constant 0 : index
    %c0_28 = arith.constant 0 : index
    %60 = vector.load %arg7[%c0_27, %c0_28] : memref<256x128xbf16, #tpu.memory_space<vmem>>, vector<256x128xbf16>
    %cst_29 = arith.constant dense<0.000000e+00> : vector<128x128xf32>
    %61 = tpu.matmul %59, %60, %cst_29 {dimension_numbers = #tpu.dot_dimension_numbers<[1], [0], [0], [1], [0, 0, 1, 1], [], []>} : vector<128x256xbf16>, vector<256x128xbf16>, vector<128x128xf32> -> vector<128x128xf32>
    %c0_30 = arith.constant 0 : index
    %c0_31 = arith.constant 0 : index
    %62 = vector.load %arg8[%c0_30, %c0_31] : memref<1x128xf32, #tpu.memory_space<vmem>>, vector<1x128xf32>
    %63 = vector.broadcast %62 : vector<1x128xf32> to vector<128x128xf32>
    %64 = arith.addf %61, %63 : vector<128x128xf32>
    %65 = tpu.iota {dimensions = array<i32: 1>} : vector<128x128xi32>
    %c9_i32 = arith.constant 9 : i32
    %66 = vector.broadcast %c9_i32 : i32 to vector<128x128xi32>
    %67 = arith.cmpi slt, %65, %66 : vector<128x128xi32>
    %cst_32 = arith.constant -1.000000e+30 : f32
    %68 = vector.broadcast %cst_32 : f32 to vector<128x128xf32>
    %69 = arith.select %67, %64, %68 : vector<128x128xi1>, vector<128x128xf32>
    %cst_33 = arith.constant dense<0xFF800000> : vector<128xf32>
    %70 = vector.multi_reduction <maximumf>, %69, %cst_33 [1] : vector<128x128xf32> to vector<128xf32>
    %71 = vector.shape_cast %70 : vector<128xf32> to vector<128x1xf32>
    %72 = vector.broadcast %71 : vector<128x1xf32> to vector<128x128xf32>
    %73 = arith.subf %69, %72 : vector<128x128xf32>
    %74 = math.exp %73 : vector<128x128xf32>
    %cst_34 = arith.constant dense<0.000000e+00> : vector<128xf32>
    %75 = vector.multi_reduction <add>, %74, %cst_34 [1] : vector<128x128xf32> to vector<128xf32>
    %76 = vector.shape_cast %75 : vector<128xf32> to vector<128x1xf32>
    %77 = tpu.reciprocal %76 : vector<128x1xf32> -> vector<128x1xf32>
    %78 = vector.broadcast %77 : vector<128x1xf32> to vector<128x128xf32>
    %79 = arith.mulf %74, %78 : vector<128x128xf32>
    %c0_35 = arith.constant 0 : index
    %c0_36 = arith.constant 0 : index
    %80 = vector.load %arg9[%c0_35, %c0_36] : memref<128x128xf32, #tpu.memory_space<vmem>>, vector<128x128xf32>
    tpu.vector_store %arg9[%c0_35, %c0_36], %79 {strides = array<i32>} : memref<128x128xf32, #tpu.memory_space<vmem>>, vector<128x128xf32>,
    return
  }
}

</mosaic_0001>

<bundles_post_ra>
// kernel: model_forward.1
= control target key start
LH: loop header
LB: loop body
LE: loop exit
PB: predicated region body
PF: predicated region fallthrough
CT: control target
= control target key end

     0   :  { %14 = vsyncpa [#allocation3], 0  ;;  %s3866_s0 = inlined_call_operand.vmem [shape: bf16[128,32], index: 0, kind: input, shape index: {}]   ;;  %s3867_s1 = inlined_call_operand.vmem [shape: bf16[32,384], index: 1, kind: input, shape index: {}]   ;;  %s3868_s2 = inlined_call_operand.vmem [shape: f32[1,384], index: 2, kind: input, shape index: {}]   ;;  %s3869_s3 = inlined_call_operand.vmem [shape: f32[1,384], index: 3, kind: input, shape index: {}]   ;;  %s3870_s4 = inlined_call_operand.hbm [shape: bf16[384,256], index: 4, kind: input, shape index: {}]   ;;  %s3871_s5 = inlined_call_operand.vmem [shape: f32[1,256], index: 5, kind: input, shape index: {}]   ;;  %s3872_s6 = inlined_call_operand.vmem [shape: f32[1,256], index: 6, kind: input, shape index: {}]   ;;  %s3873_s7 = inlined_call_operand.hbm [shape: bf16[256,128], index: 7, kind: input, shape index: {}]   ;;  %s3874_s8 = inlined_call_operand.vmem [shape: f32[1,128], index: 8, kind: input, shape index: {}]   ;;  %s3875_s9 = inlined_call_operand.vmem [shape: f32[128,128], index: 9, kind: output, shape index: {}]  }
   0x1   :  { %15 = vsyncpa [#allocation5], 0  ;;  %s2528_s30 = smov [#allocation2]  }
   0x2   :  { %s29_s10 = sshll.u32 %s2528_s30, 4  ;;  %s30_s10 = int_to_ptr.vmem [resolvable:$true] %s29_s10 }
   0x3   :  { %s2492_s11 = scalar_lea.vmem %s30_s10, 6144  ;;  %p2497_p1 = scmp.lt.s32.totalorder %s30_s10, %s30_s10 }
   0x4   :  { %p2493_p0 = scmp.ne.s32.totalorder %s30_s10, %s2492_s11  ;;  %p2498_p2 = scmp.lt.s32.totalorder %s2492_s11, %s2492_s11 }
   0x6   :  { %p2499_p3 = por %p2498_p2, %p2497_p1 }
   0x8   :  { %p2500_p4 = pnand %p2499_p3, %p2493_p0 }
   0xa   :  { %2503 = shalt.err (!%p2500_p4)
}
   0xb   :  { %s2529_s12 = smov 128   ;;  %s2530_s13 = smov 8  }
   0xc   :  { %35 = dma.hbm_to_vmem [thread:$0]  %s3870_s4, 6144, %s30_s10, [#allocation3], %s2529_s12, %s2529_s12, %s2530_s13  }
   0xd   :  { %s2531_s16 = smov [#allocation4]  }
   0xe   :  { %s45_s17 = sshll.u32 %s2531_s16, 4  ;;  %s46_s17 = int_to_ptr.vmem [resolvable:$true] %s45_s17 }
   0xf   :  { %s2512_s18 = scalar_lea.vmem %s46_s17, 2048  ;;  %p2517_p6 = scmp.lt.s32.totalorder %s46_s17, %s46_s17 }
  0x10   :  { %p2513_p5 = scmp.ne.s32.totalorder %s46_s17, %s2512_s18  ;;  %p2518_p7 = scmp.lt.s32.totalorder %s2512_s18, %s2512_s18 }
  0x12   :  { %p2519_p8 = por %p2518_p7, %p2517_p6 }
  0x14   :  { %p2520_p9 = pnand %p2519_p8, %p2513_p5 }
  0x16   :  { %2523 = shalt.err (!%p2520_p9)
}
  0x17   :  { %s2532_s19 = smov 64   ;;  %s2533_s20 = smov 4  }
  0x18   :  { %51 = dma.hbm_to_vmem [thread:$0]  %s3873_s7, 2048, %s46_s17, [#allocation5], %s2532_s19, %s2532_s19, %s2533_s20  }
  0x19   :  { %2524 = dma.done.wait [#allocation3], 6144  }
  0x1a   :  { %2525 = vsyncadd [#allocation3], 4294961152 }
  0x1b   :  { %2526 = dma.done.wait [#allocation5], 2048  }
  0x1c   :  { %2527 = vsyncadd [#allocation5], 4294965248  ;;  %v3876_v0 = vmov 0   ;;  %v2258_v1 = vld [vmem:[%s3867_s1 + $0x1c] ss:$12 sps:$4 sm:$0xff]   ;;  %v2264_v5 = vld [vmem:[%s3866_s0] sm:$0xff]  }
  0x1d   :  { %214 = vmatprep.mubr.bf16.mxu0 %v3876_v0  ;;  %v2260_v2 = vld [vmem:[%s3867_s1 + $0x18] ss:$12 sps:$4 sm:$0xff]   ;;  %194 = vmatprep.subr.bf16.mxu0 %v2258_v1  ;;  %v2263_v4 = vld [vmem:[%s3867_s1] ss:$12 sps:$4 sm:$0xff]   ;;  %vm157_vm0 = vcmask 261120   ;;  %v2268_v9 = vld [vmem:[%s3866_s0 + $0x10] sm:$0xff]  }
  0x1e   :  { %v2261_v3 = vld [vmem:[%s3867_s1 + $0x4] ss:$12 sps:$4 sm:$0xff]   ;;  %195 = vmatpush1.bf16.msra.mxu0 %v2260_v2  ;;  %v2265_v6 = vld [vmem:[%s3867_s1 + $0x20] ss:$12 sps:$4 sm:$0xff]   ;;  %2218 = vmatprep.mubr.msk.bf16.mxu1 %vm157_vm0, %v2264_v5  ;;  %v2267_v7 = vld [vmem:[%s3867_s1 + $0x8] ss:$12 sps:$4 sm:$0xff]  }
  0x1f   :  { %196 = vmatprep.subr.bf16.mxu0 %v2261_v3  ;;  %2214 = vmatprep.subr.bf16.mxu1 %v2265_v6  ;;  %v2266_v8 = vld [vmem:[%s3866_s0 + $0x8] sm:$0xff]   ;;  %v2269_v10 = vld [vmem:[%s3866_s0 + $0x18] sm:$0xff]   ;;  %v2270_v11 = vld [vmem:[%s3866_s0 + $0x20] sm:$0xff]  }
  0x20   :  { %2215 = vmatpush3.bf16.msra.mxu1 %v2265_v6  ;;  %v2271_v12 = vld [vmem:[%s3866_s0 + $0x28] sm:$0xff]   ;;  %v2272_v13 = vld [vmem:[%s3866_s0 + $0x30] sm:$0xff]   ;;  %v2273_v14 = vld [vmem:[%s3866_s0 + $0x38] sm:$0xff]  }
  0x21   :  { %2216 = vmatprep.subr.bf16.mxu1 %v2267_v7  ;;  %v2276_v15 = vld [vmem:[#allocation2 + $0x74] ss:$8 sps:$4 sm:$0xff]   ;;  %v2274_v16 = vld [vmem:[#allocation2 + $0x70] ss:$8 sps:$4 sm:$0xff]   ;;  %v2279_v17 = vld [vmem:[#allocation2 + $0x64] ss:$8 sps:$4 sm:$0xff]  }
  0x22   :  { %197 = vmatpush1.bf16.msra.mxu0 %v2263_v4  ;;  %v2277_v18 = vld [vmem:[#allocation2 + $0x60] ss:$8 sps:$4 sm:$0xff]   ;;  %v2282_v19 = vld [vmem:[#allocation2 + $0x54] ss:$8 sps:$4 sm:$0xff]   ;;  %v2280_v20 = vld [vmem:[#allocation2 + $0x50] ss:$8 sps:$4 sm:$0xff]  }
  0x23   :  { %1112 = vmatprep.subr.bf16.mxu0 %v2276_v15  ;;  %v2285_v21 = vld [vmem:[#allocation2 + $0x44] ss:$8 sps:$4 sm:$0xff]   ;;  %v2283_v22 = vld [vmem:[#allocation2 + $0x40] ss:$8 sps:$4 sm:$0xff]   ;;  %v2288_v23 = vld [vmem:[#allocation2 + $0x34] ss:$8 sps:$4 sm:$0xff]  }
  0x24   :  { %2217 = vmatpush3.bf16.msra.mxu1 %v2267_v7  ;;  %v2286_v24 = vld [vmem:[#allocation2 + $0x30] ss:$8 sps:$4 sm:$0xff]   ;;  %v2291_v25 = vld [vmem:[#allocation2 + $0x24] ss:$8 sps:$4 sm:$0xff]   ;;  %v2289_v26 = vld [vmem:[#allocation2 + $0x20] ss:$8 sps:$4 sm:$0xff]  }
  0x25   :  { %2059 = vmatmul.mubr.msk.bf16.vlgmr.msra.gmra.mxu0 %vm157_vm0, %v2264_v5  ;;  %v2294_v27 = vld [vmem:[#allocation2 + $0x14] ss:$8 sps:$4 sm:$0xff]   ;;  %v2292_v28 = vld [vmem:[#allocation2 + $0x10] ss:$8 sps:$4 sm:$0xff]   ;;  %v2297_v29 = vld [vmem:[#allocation2 + $0x4] ss:$8 sps:$4 sm:$0xff]  }
  0x26   :  { %224 = vmatprep.mubr.bf16.mxu0 %v3876_v0  ;;  %1113 = vmatpush1.bf16.msra.mxu0 %v2274_v16  ;;  %v2295_v30 = vld [vmem:[#allocation2] ss:$8 sps:$4 sm:$0xff]   ;;  %v2659_v31 = vld [vmem:[#allocation2 + $0x174] ss:$8 sps:$4 sm:$0xff]   ;;  %v2661_v33 = vld [vmem:[#allocation2 + $0x170] ss:$8 sps:$4 sm:$0xff]  }
  0x27   :  { %2219 = vmatmul.mubr.msk.bf16.vlgmr.msra.gmra.mxu1 %vm157_vm0, %v2266_v8  ;;  %1114 = vmatprep.subr.bf16.mxu0 %v2279_v17  ;;  %v2300_v32 = vld [vmem:[#allocation2 + $0xf4] ss:$8 sps:$4 sm:$0xff]   ;;  %v2298_v34 = vld [vmem:[#allocation2 + $0xf0] ss:$8 sps:$4 sm:$0xff]   ;;  %v2665_v35 = vld [vmem:[#allocation2 + $0x164] ss:$8 sps:$4 sm:$0xff]  }
  0x28   :  { %2222 = vmatprep.mubr.msk.bf16.mxu1 %vm157_vm0, %v2268_v9  ;;  %2234 = vmatprep.subr.bf16.mxu1 %v2659_v31  ;;  %v2306_v36 = vld [vmem:[#allocation2 + $0xe4] ss:$8 sps:$4 sm:$0xff]   ;;  %v2667_v37 = vld [vmem:[#allocation2 + $0x160] ss:$8 sps:$4 sm:$0xff]   ;;  %v2671_v39 = vld [vmem:[#allocation2 + $0x154] ss:$8 sps:$4 sm:$0xff]  }
  0x29   :  { %2242 = vmatpush1.bf16.msra.mxu1 %v2661_v33  ;;  %3915 = vst [vmem:[#allocation8_spill] sm:$0xff] %v2667_v37  ;;  %v2304_v38 = vld [vmem:[#allocation2 + $0xe0] ss:$8 sps:$4 sm:$0xff]   ;;  %3916 = vst [vmem:[#allocation9_spill] sm:$0xff] %v2671_v39  ;;  %v2312_v40 = vld [vmem:[#allocation2 + $0xd4] ss:$8 sps:$4 sm:$0xff]  }
  0x2a   :  { %1115 = vmatpush1.bf16.msra.mxu0 %v2277_v18  ;;  %2235 = vmatprep.subr.bf16.mxu1 %v2665_v35  ;;  %v2673_v41 = vld [vmem:[#allocation2 + $0x150] ss:$8 sps:$4 sm:$0xff]   ;;  %v2677_v43 = vld [vmem:[#allocation2 + $0x144] ss:$8 sps:$4 sm:$0xff]   ;;  %v2679_v45 = vld [vmem:[#allocation2 + $0x140] ss:$8 sps:$4 sm:$0xff]  }
  0x2b   :  { %1116 = vmatprep.subr.bf16.mxu0 %v2282_v19  ;;  %3917 = vst [vmem:[#allocation10_spill] sm:$0xff] %v2673_v41  ;;  %v2310_v42 = vld [vmem:[#allocation2 + $0xd0] ss:$8 sps:$4 sm:$0xff]   ;;  %3918 = vst [vmem:[#allocation11_spill] sm:$0xff] %v2677_v43  ;;  %v2318_v44 = vld [vmem:[#allocation2 + $0xc4] ss:$8 sps:$4 sm:$0xff]  }
  0x2c   :  { %3919 = vst [vmem:[#allocation12_spill] sm:$0xff] %v2679_v45  ;;  %v2316_v46 = vld [vmem:[#allocation2 + $0xc0] ss:$8 sps:$4 sm:$0xff]   ;;  %v2685_v48 = vld [vmem:[#allocation2 + $0x134] ss:$8 sps:$4 sm:$0xff]  }
  0x2d   :  { %2060 = vmatmul.mubr.msk.bf16.gmra.mxu0 %vm157_vm0, %v2266_v8  ;;  %2243 = vmatpush1.bf16.msra.mxu1 %v2667_v37  ;;  %3920 = vst [vmem:[#allocation13_spill] sm:$0xff] %v2685_v48  ;;  %v2324_v50 = vld [vmem:[#allocation2 + $0xb4] ss:$8 sps:$4 sm:$0xff]   ;;  %v2689_v51 = vld [vmem:[#allocation2 + $0x130] ss:$8 sps:$4 sm:$0xff]  }
  0x2e   :  { %234 = vmatprep.mubr.bf16.mxu0 %v3876_v0  ;;  %1117 = vmatpush1.bf16.msra.mxu0 %v2280_v20  ;;  %3921 = vst [vmem:[#allocation14_spill] sm:$0xff] %v2689_v51  ;;  %v2322_v52 = vld [vmem:[#allocation2 + $0xb0] ss:$8 sps:$4 sm:$0xff]   ;;  %v2330_v53 = vld [vmem:[#allocation2 + $0xa4] ss:$8 sps:$4 sm:$0xff]  }
  0x2f   :  { %2223 = vmatmul.mubr.msk.bf16.gmra.mxu1 %vm157_vm0, %v2269_v10  ;;  %1118 = vmatprep.subr.bf16.mxu0 %v2285_v21  ;;  %v2697_v56 = vld [vmem:[#allocation2 + $0x120] ss:$8 sps:$4 sm:$0xff]   ;;  %v2699_v57 = vld [vmem:[#allocation2 + $0x124] ss:$8 sps:$4 sm:$0xff]   ;;  %v2336_v61 = vld [vmem:[#allocation2 + $0x94] ss:$8 sps:$4 sm:$0xff]  }
  0x30   :  { %2226 = vmatprep.mubr.msk.bf16.mxu1 %vm157_vm0, %v2270_v11  ;;  %2236 = vmatprep.subr.bf16.mxu1 %v2671_v39  ;;  %3922 = vst [vmem:[#allocation15_spill] sm:$0xff] %v2697_v56  ;;  %3923 = vst [vmem:[#allocation16_spill] sm:$0xff] %v2699_v57  ;;  %v2328_v58 = vld [vmem:[#allocation2 + $0xa0] ss:$8 sps:$4 sm:$0xff]   ;;  %v2706_v62 = vld [vmem:[#allocation2 + $0x114] ss:$8 sps:$4 sm:$0xff]  }
  0x31   :  { %2244 = vmatpush1.bf16.msra.mxu1 %v2673_v41  ;;  %3924 = vst [vmem:[#allocation17_spill] sm:$0xff] %v2706_v62  ;;  %v2713_v2 = vld [vmem:[#allocation2 + $0x110] ss:$8 sps:$4 sm:$0xff]   ;;  %v2342_v7 = vld [vmem:[#allocation2 + $0x84] ss:$8 sps:$4 sm:$0xff]  }
  0x32   :  { %1119 = vmatpush1.bf16.msra.mxu0 %v2283_v22  ;;  %2237 = vmatprep.subr.bf16.mxu1 %v2677_v43  ;;  %3925 = vst [vmem:[#allocation18_spill] sm:$0xff] %v2713_v2  ;;  %v2334_v3 = vld [vmem:[#allocation2 + $0x90] ss:$8 sps:$4 sm:$0xff]   ;;  %v2722_v8 = vld [vmem:[#allocation2 + $0x104] ss:$8 sps:$4 sm:$0xff]  }
  0x33   :  { %1120 = vmatprep.subr.bf16.mxu0 %v2288_v23  ;;  %3926 = vst [vmem:[#allocation19_spill] sm:$0xff] %v2722_v8  ;;  %v2340_v16 = vld [vmem:[#allocation2 + $0x80] ss:$8 sps:$4 sm:$0xff]  }
  0x35   :  { %2061 = vmatmul.mubr.msk.bf16.gmra.mxu0 %vm157_vm0, %v2268_v9  ;;  %2245 = vmatpush1.bf16.msra.mxu1 %v2679_v45 }
  0x36   :  { %244 = vmatprep.mubr.bf16.mxu0 %v3876_v0  ;;  %1121 = vmatpush1.bf16.msra.mxu0 %v2286_v24 }
  0x37   :  { %2227 = vmatmul.mubr.msk.bf16.gmra.mxu1 %vm157_vm0, %v2271_v12  ;;  %1122 = vmatprep.subr.bf16.mxu0 %v2291_v25 }
  0x38   :  { %2230 = vmatprep.mubr.msk.bf16.mxu1 %vm157_vm0, %v2272_v13  ;;  %2238 = vmatprep.subr.bf16.mxu1 %v2685_v48 }
  0x39   :  { %2246 = vmatpush1.bf16.msra.mxu1 %v2689_v51 }
  0x3a   :  { %1123 = vmatpush1.bf16.msra.mxu0 %v2289_v26  ;;  %2239 = vmatprep.subr.bf16.mxu1 %v2699_v57 }
  0x3b   :  { %1124 = vmatprep.subr.bf16.mxu0 %v2294_v27 }
  0x3d   :  { %2062 = vmatmul.mubr.msk.bf16.gmra.mxu0 %vm157_vm0, %v2269_v10  ;;  %2247 = vmatpush1.bf16.msra.mxu1 %v2697_v56 }
  0x3e   :  { %254 = vmatprep.mubr.bf16.mxu0 %v3876_v0  ;;  %1125 = vmatpush1.bf16.msra.mxu0 %v2292_v28 }
  0x3f   :  { %2231 = vmatmul.mubr.msk.bf16.gmra.mxu1 %vm157_vm0, %v2273_v14  ;;  %1126 = vmatprep.subr.bf16.mxu0 %v2297_v29 }
  0x40   :  { %1277 = vmatprep.mubr.bf16.mxu1 %v3876_v0  ;;  %2240 = vmatprep.subr.bf16.mxu1 %v2706_v62 }
  0x41   :  { %2248 = vmatpush1.bf16.msra.mxu1 %v2713_v2 }
  0x42   :  { %1127 = vmatpush1.bf16.msra.mxu0 %v2295_v30  ;;  %2241 = vmatprep.subr.bf16.mxu1 %v2722_v8 }
  0x43   :  { %1128 = vmatprep.subr.bf16.mxu0 %v2300_v32 }
  0x45   :  { %2063 = vmatmul.mubr.msk.bf16.gmra.mxu0 %vm157_vm0, %v2270_v11 }
  0x46   :  { %264 = vmatprep.mubr.bf16.mxu0 %v3876_v0  ;;  %1129 = vmatpush2.bf16.msra.mxu0 %v2298_v34 }
  0x47   :  { %1130 = vmatprep.subr.bf16.mxu0 %v2306_v36 }
  0x4a   :  { %1131 = vmatpush2.bf16.msra.mxu0 %v2304_v38 }
  0x4b   :  { %1132 = vmatprep.subr.bf16.mxu0 %v2312_v40 }
  0x4d   :  { %2064 = vmatmul.mubr.msk.bf16.gmra.mxu0 %vm157_vm0, %v2271_v12 }
  0x4e   :  { %274 = vmatprep.mubr.bf16.mxu0 %v3876_v0  ;;  %1133 = vmatpush2.bf16.msra.mxu0 %v2310_v42 }
  0x4f   :  { %1134 = vmatprep.subr.bf16.mxu0 %v2318_v44 }
  0x52   :  { %1135 = vmatpush2.bf16.msra.mxu0 %v2316_v46 }
  0x53   :  { %1136 = vmatprep.subr.bf16.mxu0 %v2324_v50 }
  0x55   :  { %2065 = vmatmul.mubr.msk.bf16.gmra.mxu0 %vm157_vm0, %v2272_v13 }
  0x56   :  { %284 = vmatprep.mubr.bf16.mxu0 %v3876_v0  ;;  %1137 = vmatpush2.bf16.msra.mxu0 %v2322_v52 }
  0x57   :  { %1138 = vmatprep.subr.bf16.mxu0 %v2330_v53 }
  0x5a   :  { %1139 = vmatpush2.bf16.msra.mxu0 %v2328_v58 }
  0x5b   :  { %1140 = vmatprep.subr.bf16.mxu0 %v2336_v61 }
  0x5d   :  { %2066 = vmatmul.mubr.msk.bf16.gmra.mxu0 %vm157_vm0, %v2273_v14  ;;  %v2735_v14 = vld [vmem:[#allocation2 + $0x100] ss:$8 sps:$4 sm:$0xff]  }
  0x5e   :  { %3927 = vst [vmem:[#allocation20_spill] sm:$0xff] %v2735_v14  ;;  %1141 = vmatpush2.bf16.msra.mxu0 %v2334_v3  ;;  %2249 = vmatpush1.bf16.msra.mxu1 %v2735_v14 }
  0x5f   :  { %1142 = vmatprep.subr.bf16.mxu0 %v2342_v7 }
  0x62   :  { %1143 = vmatpush2.bf16.msra.mxu0 %v2340_v16 }
  0x63   :  { %1225 = vmatprep.subr.bf16.mxu0 %v2659_v31 }
  0xe5   :  { %v2682_v47 = vpop.f32.mrf.mxu0 }
  0xe7   :  { %v2687_v49 = vpop.f32.mrf.mxu0  ;;  %v2694_v55 = vpop.f32.mrf.mxu1 }
  0xe8   :  { %v463_v11 = vmul.f32 %v2694_v55, %v2694_v55 }
  0xe9   :  { %v2692_v54 = vpop.f32.mrf.mxu0  ;;  %v2703_v60 = vpop.f32.mrf.mxu1 }
  0xea   :  { %v457_v5 = vmul.f32 %v2703_v60, %v2703_v60 }
  0xeb   :  { %v2701_v59 = vpop.f32.mrf.mxu0  ;;  %v2710_v1 = vpop.f32.mrf.mxu1 }
  0xec   :  { %v466_v18 = vmul.f32 %v2710_v1, %v2710_v1 }
  0xed   :  { %v2708_v63 = vpop.f32.mrf.mxu0  ;;  %v2719_v6 = vpop.f32.mrf.mxu1 }
  0xee   :  { %v434_v9 = vadd.f32 %v2719_v6, %v2703_v60  ;;  %v460_v12 = vmul.f32 %v2719_v6, %v2719_v6 }
  0xef   :  { %v2715_v4 = vpop.f32.mrf.mxu0  ;;  %v2732_v13 = vpop.f32.mrf.mxu1 }
  0xf0   :  { %v435_v15 = vadd.f32 %v2694_v55, %v434_v9  ;;  %v545_v19 = vadd.f32 %v460_v12, %v457_v5  ;;  %v475_v34 = vmul.f32 %v2732_v13, %v2732_v13 }
  0xf1   :  { %v2726_v10 = vpop.f32.mrf.mxu0  ;;  %v2742_v20 = vpop.f32.mrf.mxu1 }
  0xf2   :  { %v436_v21 = vadd.f32 %v2710_v1, %v435_v15  ;;  %v546_v23 = vadd.f32 %v545_v19, %v463_v11  ;;  %v469_v24 = vmul.f32 %v2742_v20, %v2742_v20 }
  0xf3   :  { %v2738_v17 = vpop.f32.mrf.mxu0  ;;  %v2750_v25 = vpop.f32.mrf.mxu1 }
  0xf4   :  { %v437_v26 = vadd.f32 %v436_v21, %v2742_v20  ;;  %v547_v28 = vadd.f32 %v546_v23, %v466_v18  ;;  %v478_v31 = vmul.f32 %v2750_v25, %v2750_v25  ;;  %v458_v23 = vmul.f32 %v2692_v54, %v2692_v54 }
  0xf5   :  { %v2746_v22 = vpop.f32.mrf.mxu0  ;;  %v2756_v29 = vpop.f32.mrf.mxu1 }
  0xf6   :  { %v438_v30 = vadd.f32 %v437_v26, %v2756_v29  ;;  %v548_v36 = vadd.f32 %v547_v28, %v469_v24  ;;  %v472_v38 = vmul.f32 %v2756_v29, %v2756_v29  ;;  %v459_v26 = vmul.f32 %v2701_v59, %v2701_v59 }
  0xf7   :  { %v2754_v27 = vpop.f32.mrf.mxu0  ;;  %v2766_v40 = vpop.f32.mrf.mxu1  ;;  %v467_v62 = vmul.f32 %v2746_v22, %v2746_v22 }
  0xf8   :  { %v439_v42 = vadd.f32 %v2732_v13, %v438_v30  ;;  %v549_v46 = vadd.f32 %v548_v36, %v472_v38  ;;  %v487_v16 = vmul.f32 %v2766_v40, %v2766_v40  ;;  %v455_v38 = vmul.f32 %v2682_v47, %v2682_v47 }
  0xf9   :  { %v2760_v32 = vpop.f32.mrf.mxu0  ;;  %v2773_v50 = vpop.f32.mrf.mxu1  ;;  %v468_v57 = vmul.f32 %v2754_v27, %v2754_v27 }
  0xfa   :  { %v440_v52 = vadd.f32 %v2750_v25, %v439_v42  ;;  %v550_v58 = vadd.f32 %v549_v46, %v475_v34  ;;  %v481_v61 = vmul.f32 %v2773_v50, %v2773_v50  ;;  %v461_v42 = vmul.f32 %v2708_v63, %v2708_v63 }
  0xfb   :  { %v2769_v44 = vpop.f32.mrf.mxu0  ;;  %v2780_v3 = vpop.f32.mrf.mxu1  ;;  %v456_v46 = vmul.f32 %v2687_v49, %v2687_v49 }
  0xfc   :  { %v441_v5 = vadd.f32 %v440_v52, %v2773_v50  ;;  %v551_v9 = vadd.f32 %v550_v58, %v478_v31  ;;  %v490_v30 = vmul.f32 %v2780_v3, %v2780_v3 }
  0xfd   :  { %v2776_v53 = vpop.f32.mrf.mxu0  ;;  %v2785_v11 = vpop.f32.mrf.mxu1  ;;  %v524_v0 = vadd.f32 %v459_v26, %v456_v46 }
  0xfe   :  { %v442_v12 = vadd.f32 %v441_v5, %v2785_v11  ;;  %v552_v18 = vadd.f32 %v551_v9, %v481_v61  ;;  %v484_v19 = vmul.f32 %v2785_v11, %v2785_v11  ;;  %v392_v9 = vadd.f32 %v2692_v54, %v2682_v47 }
  0xff   :  { %v2783_v7 = vpop.f32.mrf.mxu0  ;;  %v2794_v21 = vpop.f32.mrf.mxu1 }
 0x100   :  { %3928 = vst [vmem:[#allocation21_spill] sm:$0xff] %v2794_v21  ;;  %v443_v24 = vadd.f32 %v2766_v40, %v442_v12  ;;  %v553_v34 = vadd.f32 %v552_v18, %v484_v19  ;;  %v503_v12 = vadd.f32 %v458_v23, %v455_v38  ;;  %v462_v18 = vmul.f32 %v2715_v4, %v2715_v4 }
 0x101   :  { %v2788_v15 = vpop.f32.mrf.mxu0  ;;  %v2805_v36 = vpop.f32.mrf.mxu1  ;;  %v393_v2 = vadd.f32 %v392_v9, %v2708_v63  ;;  %v465_v38 = vmul.f32 %v2738_v17, %v2738_v17  ;;  %v499_v46 = vmul.f32 %v2794_v21, %v2794_v21 }
 0x102   :  { %3929 = vst [vmem:[#allocation22_spill] sm:$0xff] %v2805_v36  ;;  %v444_v31 = vadd.f32 %v2780_v3, %v443_v24  ;;  %v554_v58 = vadd.f32 %v553_v34, %v487_v16  ;;  %v493_v61 = vmul.f32 %v2805_v36, %v2805_v36  ;;  %v413_v24 = vadd.f32 %v2701_v59, %v2687_v49 }
 0x103   :  { %v2801_v28 = vpop.f32.mrf.mxu0  ;;  %v2818_v5 = vpop.f32.mrf.mxu1  ;;  %v464_v16 = vmul.f32 %v2726_v10, %v2726_v10  ;;  %v504_v23 = vadd.f32 %v503_v12, %v461_v42  ;;  %v525_v42 = vadd.f32 %v524_v0, %v462_v18  ;;  %v394_v9 = vadd.f32 %v393_v2, %v2726_v10 }
 0x104   :  { %3931 = vst [vmem:[#allocation24_spill] sm:$0xff] %v2818_v5  ;;  %v445_v19 = vadd.f32 %v444_v31, %v2805_v36  ;;  %v555_v14 = vadd.f32 %v554_v58, %v490_v30  ;;  %v414_v58 = vadd.f32 %v413_v24, %v2715_v4  ;;  %v502_v48 = vmul.f32 %v2818_v5, %v2818_v5 }
 0x105   :  { %v2814_v52 = vpop.f32.mrf.mxu0  ;;  %v2831_v8 = vpop.f32.mrf.mxu1  ;;  %v395_v45 = vadd.f32 %v394_v9, %v2746_v22  ;;  %v470_v0 = vmul.f32 %v2760_v32, %v2760_v32  ;;  %v526_v18 = vadd.f32 %v525_v42, %v465_v38 }
 0x106   :  { %3930 = vst [vmem:[#allocation23_spill] sm:$0xff] %v2814_v52  ;;  %3932 = vst [vmem:[#allocation25_spill] sm:$0xff] %v2831_v8  ;;  %v446_v31 = vadd.f32 %v445_v19, %v2831_v8  ;;  %v556_v56 = vadd.f32 %v555_v14, %v493_v61  ;;  %v496_v30 = vmul.f32 %v2831_v8, %v2831_v8 }
 0x107   :  { %v2829_v34 = vpop.f32.mrf.mxu0  ;;  %v505_v19 = vadd.f32 %v504_v23, %v464_v16  ;;  %v415_v61 = vadd.f32 %v414_v58, %v2738_v17  ;;  %v471_v16 = vmul.f32 %v2769_v44, %v2769_v44  ;;  %v527_v9 = vadd.f32 %v526_v18, %v468_v57 }
 0x108   :  { %v447_v12 = vadd.f32 %v2794_v21, %v446_v31  ;;  %v557_v14 = vadd.f32 %v556_v56, %v496_v30  ;;  %v396_v56 = vadd.f32 %v395_v45, %v2760_v32  ;;  %v473_v30 = vmul.f32 %v2776_v53, %v2776_v53 }
 0x109   :  { %v2839_v26 = vpop.f32.mrf.mxu0  ;;  %v506_v24 = vadd.f32 %v505_v19, %v467_v62  ;;  %v416_v21 = vadd.f32 %v415_v61, %v2754_v27  ;;  %v528_v45 = vadd.f32 %v527_v9, %v471_v16  ;;  %v477_v61 = vmul.f32 %v2801_v28, %v2801_v28 }
 0x10a   :  { %3933 = vst [vmem:[#allocation26_spill] sm:$0xff] %v2839_v26  ;;  %v448_v2 = vadd.f32 %v2818_v5, %v447_v12  ;;  %v558_v31 = vadd.f32 %v557_v14, %v499_v46  ;;  %v474_v12 = vmul.f32 %v2783_v7, %v2783_v7  ;;  %v397_v46 = vadd.f32 %v396_v56, %v2776_v53 }
 0x10b   :  { %v2850_v51 = vpop.f32.mrf.mxu0  ;;  %v507_v42 = vadd.f32 %v506_v24, %v470_v0  ;;  %v417_v19 = vadd.f32 %v416_v21, %v2769_v44  ;;  %v476_v14 = vmul.f32 %v2788_v15, %v2788_v15  ;;  %v479_v21 = vmul.f32 %v2814_v52, %v2814_v52 }
 0x10c   :  { %v449_v58 = vrot.slane %v448_v2, 4  ;;  %v559_v62 = vadd.f32 %v558_v31, %v502_v48  ;;  %v398_v48 = vadd.f32 %v397_v46, %v2788_v15  ;;  %v529_v0 = vadd.f32 %v528_v45, %v474_v12 }
 0x10d   :  { %v2861_v23 = vpop.f32.mrf.mxu0  ;;  %v508_v43 = vadd.f32 %v507_v42, %v473_v30  ;;  %v418_v41 = vadd.f32 %v417_v19, %v2783_v7  ;;  %v480_v24 = vmul.f32 %v2829_v34, %v2829_v34  ;;  %v482_v30 = vmul.f32 %v2839_v26, %v2839_v26 }
 0x10e   :  { %3934 = vst [vmem:[#allocation27_spill] sm:$0xff] %v2861_v23  ;;  %v450_v57 = vadd.f32 %v449_v58, %v448_v2  ;;  %v560_v18 = vrot.slane %v559_v62, 4  ;;  %v399_v2 = vadd.f32 %v398_v48, %v2814_v52  ;;  %v530_v58 = vadd.f32 %v529_v0, %v477_v61 }
 0x10f   :  { %v2869_v38 = vpop.f32.mrf.mxu0  ;;  %v509_v31 = vadd.f32 %v508_v43, %v476_v14  ;;  %v419_v56 = vadd.f32 %v418_v41, %v2801_v28  ;;  %v483_v9 = vmul.f32 %v2850_v51, %v2850_v51  ;;  %v485_v41 = vmul.f32 %v2861_v23, %v2861_v23 }
 0x110   :  { %3935 = vst [vmem:[#allocation28_spill] sm:$0xff] %v2869_v38  ;;  %v451_v42 = vrot.slane %v450_v57, 2  ;;  %v561_v19 = vadd.f32 %v560_v18, %v559_v62  ;;  %v400_v43 = vadd.f32 %v399_v2, %v2839_v26  ;;  %v531_v14 = vadd.f32 %v530_v58, %v480_v24 }
 0x111   :  { %v2877_v5 = vpop.f32.mrf.mxu0  ;;  %v510_v46 = vadd.f32 %v509_v31, %v479_v21  ;;  %v420_v45 = vadd.f32 %v419_v56, %v2829_v34  ;;  %v486_v48 = vmul.f32 %v2869_v38, %v2869_v38 }
 0x112   :  { %3936 = vst [vmem:[#allocation29_spill] sm:$0xff] %v2877_v5  ;;  %v401_v62 = vadd.f32 %v400_v43, %v2861_v23  ;;  %v488_v18 = vmul.f32 %v2877_v5, %v2877_v5  ;;  %v532_v21 = vadd.f32 %v531_v14, %v483_v9  ;;  %v452_v31 = vadd.f32 %v451_v42, %v450_v57 }
 0x113   :  { %v2885_v16 = vpop.f32.mrf.mxu0  ;;  %v511_v0 = vadd.f32 %v510_v46, %v482_v30  ;;  %v421_v52 = vadd.f32 %v420_v45, %v2850_v51  ;;  %v562_v56 = vrot.slane %v561_v19, 2 }
 0x114   :  { %3937 = vst [vmem:[#allocation30_spill] sm:$0xff] %v2885_v16  ;;  %v489_v2 = vmul.f32 %v2885_v16, %v2885_v16  ;;  %v402_v30 = vadd.f32 %v401_v62, %v2877_v5  ;;  %v533_v45 = vadd.f32 %v532_v21, %v486_v48 }
 0x115   :  { %v2893_v12 = vpop.f32.mrf.mxu0  ;;  %v512_v58 = vadd.f32 %v511_v0, %v485_v41  ;;  %v422_v26 = vadd.f32 %v421_v52, %v2869_v38  ;;  %v453_v52 = vrot.slane %v452_v31, 1  ;;  %v563_v0 = vadd.f32 %v562_v56, %v561_v19 }
 0x116   :  { %3938 = vst [vmem:[#allocation31_spill] sm:$0xff] %v2893_v12  ;;  %v491_v46 = vmul.f32 %v2893_v12, %v2893_v12  ;;  %v403_v14 = vadd.f32 %v402_v30, %v2893_v12  ;;  %v534_v62 = vadd.f32 %v533_v45, %v489_v2 }
 0x117   :  { %v2901_v61 = vpop.f32.mrf.mxu0  ;;  %v513_v57 = vadd.f32 %v512_v58, %v488_v18  ;;  %v423_v42 = vadd.f32 %v422_v26, %v2885_v16  ;;  %v454_v45 = vadd.f32 %v453_v52, %v452_v31 }
 0x118   :  { %3939 = vst [vmem:[#allocation32_spill] sm:$0xff] %v2901_v61  ;;  %v492_v43 = vmul.f32 %v2901_v61, %v2901_v61 }
 0x119   :  { %v2909_v24 = vpop.f32.mrf.mxu0  ;;  %v514_v21 = vadd.f32 %v513_v57, %v491_v46  ;;  %v424_v23 = vadd.f32 %v423_v42, %v2901_v61  ;;  %v564_v46 = vrot.slane %v563_v0, 1  ;;  %v2948_v52 = vmul.f32 0.0078125, %v454_v45 }
 0x11a   :  { %3940 = vst [vmem:[#allocation33_spill] sm:$0xff] %v2909_v24  ;;  %v494_v41 = vmul.f32 %v2909_v24, %v2909_v24  ;;  %v404_v18 = vadd.f32 %v403_v14, %v2909_v24  ;;  %v535_v58 = vadd.f32 %v534_v62, %v492_v43 }
 0x11b   :  { %v2917_v9 = vpop.f32.mrf.mxu0  ;;  %v565_v31 = vadd.f32 %v564_v46, %v563_v0 }
 0x11c   :  { %3941 = vst [vmem:[#allocation34_spill] sm:$0xff] %v2917_v9  ;;  %v495_v5 = vmul.f32 %v2917_v9, %v2917_v9  ;;  %v515_v12 = vadd.f32 %v514_v21, %v494_v41  ;;  %v425_v19 = vadd.f32 %v424_v23, %v2917_v9 }
 0x11d   :  { %v2925_v48 = vpop.f32.mrf.mxu0 }
 0x11e   :  { %3942 = vst [vmem:[#allocation35_spill] sm:$0xff] %v2925_v48  ;;  %v497_v26 = vmul.f32 %v2925_v48, %v2925_v48  ;;  %v405_v56 = vadd.f32 %v404_v18, %v2925_v48  ;;  %v536_v57 = vadd.f32 %v535_v58, %v495_v5 }
 0x11f   :  { %v2931_v30 = vpop.f32.mrf.mxu0 }
 0x120   :  { %v498_v2 = vmul.f32 %v2931_v30, %v2931_v30  ;;  %v516_v14 = vadd.f32 %v515_v12, %v497_v26  ;;  %v426_v24 = vadd.f32 %v425_v19, %v2931_v30 }
 0x121   :  { %v2937_v42 = vpop.f32.mrf.mxu0 }
 0x122   :  { %3943 = vst [vmem:[#allocation36_spill] sm:$0xff] %v2937_v42  ;;  %v406_v43 = vadd.f32 %v405_v56, %v2937_v42  ;;  %v500_v41 = vmul.f32 %v2937_v42, %v2937_v42  ;;  %v537_v62 = vadd.f32 %v536_v57, %v498_v2  ;;  %v571_v57 = vmul.f32 0.0078125, %v565_v31 }
 0x123   :  { %v2943_v23 = vpop.f32.mrf.mxu0 }
 0x124   :  { %v407_v21 = vrot.slane %v406_v43, 4  ;;  %v517_v18 = vadd.f32 %v516_v14, %v500_v41  ;;  %v427_v48 = vadd.f32 %v426_v24, %v2943_v23  ;;  %v501_v5 = vmul.f32 %v2943_v23, %v2943_v23 }
 0x125   :  { %v574_v14 = vmul.f32 %v2948_v52, %v2948_v52 }
 0x126   :  { %v408_v12 = vadd.f32 %v407_v21, %v406_v43  ;;  %v518_v26 = vrot.slane %v517_v18, 4  ;;  %v428_v58 = vrot.slane %v427_v48, 4  ;;  %v538_v19 = vadd.f32 %v537_v62, %v501_v5 }
 0x127   :  { %v577_v43 = vsub.f32 %v571_v57, %v574_v14 }
 0x128   :  { %v409_v56 = vrot.slane %v408_v12, 2  ;;  %v519_v9 = vadd.f32 %v518_v26, %v517_v18  ;;  %v429_v42 = vadd.f32 %v428_v58, %v427_v48  ;;  %v539_v2 = vrot.slane %v538_v19, 4 }
 0x129   :  { %v580_v58 = vmax.f32 %v577_v43, 0.0 }
 0x12a   :  { %v410_v41 = vadd.f32 %v409_v56, %v408_v12  ;;  %v520_v24 = vrot.slane %v519_v9, 2  ;;  %v430_v61 = vrot.slane %v429_v42, 2  ;;  %v540_v16 = vadd.f32 %v539_v2, %v538_v19 }
 0x12c   :  { %v411_v38 = vrot.slane %v410_v41, 1  ;;  %v521_v0 = vadd.f32 %v520_v24, %v519_v9  ;;  %v431_v45 = vadd.f32 %v430_v61, %v429_v42  ;;  %v541_v46 = vrot.slane %v540_v16, 2 }
 0x12d   :  { %v584_v9 = vadd.f32 1e-05, %v580_v58 }
 0x12e   :  { %v412_v21 = vadd.f32 %v411_v38, %v410_v41  ;;  %v522_v8 = vrot.slane %v521_v0, 1  ;;  %v432_v62 = vrot.slane %v431_v45, 1  ;;  %v542_v5 = vadd.f32 %v541_v46, %v540_v16 }
 0x12f   :  { %2362 = vrsqrt.f32 %v584_v9  ;;  %v3907_v41 = vlaneseq }
 0x130   :  { %v523_v18 = vadd.f32 %v522_v8, %v521_v0  ;;  %v566_v48 = vmul.f32 0.0078125, %v412_v21  ;;  %v433_v26 = vadd.f32 %v432_v62, %v431_v45  ;;  %v543_v31 = vrot.slane %v542_v5, 1 }
 0x131   :  { %v2535_v8 = vmov 1966171168   ;;  %v596_v0 = vshrl.u32 %v3907_v41, 7 }
 0x132   :  { %v569_v36 = vmul.f32 0.0078125, %v523_v18  ;;  %v572_v39 = vmul.f32 %v566_v48, %v566_v48  ;;  %v544_v12 = vadd.f32 %v543_v31, %v542_v5  ;;  %v567_v56 = vmul.f32 0.0078125, %v433_v26  ;;  %v581_v5 = vld [vmem:[%s3868_s2] sm:$0x7] }
 0x133   :  { %v593_v16 = vunpack.c.l.s4 %v2535_v8  ;;  %v2961_v26 = vsub.s32 0, %v596_v0  ;;  %v2963_v31 = vsub.s32 1, %v596_v0  ;;  %v628_v58 = vsub.s32 2, %v596_v0 }
 0x134   :  { %v575_v37 = vsub.f32 %v569_v36, %v572_v39  ;;  %v570_v19 = vmul.f32 0.0078125, %v544_v12  ;;  %v573_v2 = vmul.f32 %v567_v56, %v567_v56 }
 0x135   :  { %v594_v24 = vunpack.c.0.s8 %v593_v16  ;;  %3944 = vst [vmem:[#allocation37_spill] sm:$0xff] %v2963_v31 }
 0x136   :  { %v578_v61 = vmax.f32 %v575_v37, 0.0  ;;  %v576_v42 = vsub.f32 %v570_v19, %v573_v2 }
 0x137   :  { %v2953_v39 = vsub.s32 %v594_v24, %v596_v0  ;;  %v616_v0 = vld [vmem:[%s3869_s3] sm:$0x7] }
 0x138   :  { %v582_v57 = vadd.f32 1e-05, %v578_v61  ;;  %v579_v38 = vmax.f32 %v576_v42, 0.0 }
 0x13a   :  { %v583_v14 = vadd.f32 1e-05, %v579_v38  ;;  %2364 = vrsqrt.f32 %v582_v57 }
 0x13c   :  { %2366 = vrsqrt.f32 %v583_v14  ;;  %v2363_v45 = vpop.eup %2362 }
 0x13d   :  { %v605_v37 = vrot.slane %v2363_v45, %v2953_v39 }
 0x147   :  { %v2365_v46 = vpop.eup %2364 }
 0x149   :  { %v2367_v36 = vpop.eup %2366 }
 0x14a   :  { %v591_v43 = vcombine.low %v2365_v46, %v2367_v36 }
 0x14c   :  { %v598_v21 = vrot.slane %v591_v43, %v2953_v39 }
 0x14e   :  { %v606_v62 = vcombine.low %v598_v21, %v605_v37 }
 0x150   :  { %v613_v18 = vrot.slane %v606_v62, %v2953_v39 }
 0x152   :  { %v615_v12 = vmul.f32 %v613_v18, %v581_v5 }
 0x154   :  { %v2966_v19 = vrot.slane %v615_v12, %v2961_v26  ;;  %v2969_v2 = vrot.slane %v615_v12, %v2963_v31  ;;  %v2971_v9 = vrot.slane %v615_v12, %v628_v58 }
 0x156   :  { %v633_v61 = vmul.f32 %v2966_v19, %v566_v48  ;;  %v634_v42 = vmul.f32 %v2969_v2, %v567_v56  ;;  %v635_v57 = vmul.f32 %v2971_v9, %v2948_v52  ;;  %v707_v38 = vmul.f32 %v2969_v2, %v2931_v30 }
 0x157   :  { %v710_v56 = vmul.f32 %v2969_v2, %v2943_v23  ;;  %v665_v52 = vmul.f32 %v2969_v2, %v2687_v49  ;;  %v668_v30 = vmul.f32 %v2969_v2, %v2701_v59  ;;  %v678_v46 = vmul.f32 %v2971_v9, %v2742_v20 }
 0x158   :  { %v639_v14 = vcombine.low %v633_v61, %v634_v42  ;;  %v653_v16 = vrot.slane %v635_v57, %v2953_v39  ;;  %v681_v23 = vmul.f32 %v2971_v9, %v2756_v29  ;;  %v664_v49 = vmul.f32 %v2966_v19, %v2682_v47 }
 0x159   :  { %v667_v59 = vmul.f32 %v2966_v19, %v2692_v54  ;;  %v671_v20 = vmul.f32 %v2969_v2, %v2715_v4  ;;  %v674_v21 = vmul.f32 %v2969_v2, %v2738_v17 }
 0x15a   :  { %v646_v8 = vrot.slane %v639_v14, %v2953_v39 }
 0x15c   :  { %v654_v24 = vcombine.low %v646_v8, %v653_v16  ;;  %v684_v8 = vmul.f32 %v2732_v13, %v2971_v9  ;;  %v687_v16 = vmul.f32 %v2750_v25, %v2971_v9  ;;  %v680_v13 = vmul.f32 %v2969_v2, %v2769_v44 }
 0x15d   :  { %v676_v44 = vmul.f32 %v2966_v19, %v2746_v22 }
 0x15e   :  { %v661_v48 = vrot.slane %v654_v24, %v2953_v39  ;;  %v670_v24 = vmul.f32 %v2966_v19, %v2708_v63 }
 0x160   :  { %v663_v45 = vsub.f32 %v616_v0, %v661_v48  ;;  %v673_v0 = vmul.f32 %v2966_v19, %v2726_v10  ;;  %v677_v48 = vmul.f32 %v2969_v2, %v2754_v27 }
 0x162   :  { %v2994_v36 = vrot.slane %v663_v45, %v2961_v26  ;;  %v2997_v43 = vrot.slane %v663_v45, %v2963_v31  ;;  %v2999_v37 = vrot.slane %v663_v45, %v628_v58 }
 0x164   :  { %v3012_v62 = vadd.f32 %v2997_v43, %v707_v38  ;;  %v3015_v5 = vadd.f32 %v2997_v43, %v710_v56  ;;  %v729_v29 = vadd.f32 %v2997_v43, %v665_v52  ;;  %v732_v18 = vadd.f32 %v2997_v43, %v668_v30 }
 0x165   :  { %v742_v47 = vadd.f32 %v2999_v37, %v678_v46  ;;  %v745_v54 = vadd.f32 %v2999_v37, %v681_v23  ;;  %v728_v58 = vadd.f32 %v2994_v36, %v664_v49  ;;  %v731_v4 = vadd.f32 %v2994_v36, %v667_v59 }
 0x166   :  { %v798_v17 = vpack.c.bf16 %v3015_v5, %v3012_v62  ;;  %v777_v12 = vpack.c.bf16 %v732_v18, %v729_v29  ;;  %v735_v61 = vadd.f32 %v2997_v43, %v671_v20  ;;  %v738_v42 = vadd.f32 %v2997_v43, %v674_v21 }
 0x167   :  { %v784_v57 = vpack.c.bf16 %v745_v54, %v742_v47  ;;  %v776_v38 = vpack.c.bf16 %v731_v4, %v728_v58  ;;  %v748_v45 = vadd.f32 %v2999_v37, %v684_v8  ;;  %v751_v56 = vadd.f32 %v2999_v37, %v687_v16 }
 0x168   :  { %v780_v14 = vpack.c.bf16 %v738_v42, %v735_v61  ;;  %2368 = vtanh.bf16 %v777_v12  ;;  %v734_v25 = vadd.f32 %v2994_v36, %v670_v24  ;;  %v737_v52 = vadd.f32 %v2994_v36, %v673_v0 }
 0x169   :  { %2370 = vtanh.bf16 %v784_v57  ;;  %v741_v63 = vadd.f32 %v2997_v43, %v677_v48  ;;  %v744_v10 = vadd.f32 %v2997_v43, %v680_v13  ;;  %v787_v30 = vpack.c.bf16 %v751_v56, %v748_v45 }
 0x16a   :  { %2372 = vtanh.bf16 %v776_v38  ;;  %v779_v27 = vpack.c.bf16 %v737_v52, %v734_v25  ;;  %v690_v23 = vmul.f32 %v2971_v9, %v2773_v50  ;;  %v693_v49 = vmul.f32 %v2971_v9, %v2785_v11  ;;  %v3946_v25 = vld [vmem:[#allocation8_spill] sm:$0xff] }
 0x16b   :  { %2374 = vtanh.bf16 %v780_v14  ;;  %v783_v46 = vpack.c.bf16 %v744_v10, %v741_v63  ;;  %v679_v59 = vmul.f32 %v2966_v19, %v2760_v32  ;;  %v683_v20 = vmul.f32 %v2969_v2, %v2783_v7  ;;  %v3947_v10 = vld [vmem:[#allocation9_spill] sm:$0xff] }
 0x16c   :  { %2376 = vtanh.bf16 %v787_v30  ;;  %v754_v21 = vadd.f32 %v2999_v37, %v690_v23  ;;  %v757_v29 = vadd.f32 %v2999_v37, %v693_v49  ;;  %v686_v50 = vmul.f32 %v2969_v2, %v2801_v28 }
 0x16d   :  { %2378 = vtanh.bf16 %v779_v27  ;;  %v740_v11 = vadd.f32 %v2994_v36, %v676_v44  ;;  %v743_v18 = vadd.f32 %v2994_v36, %v679_v59  ;;  %v747_v22 = vadd.f32 %v2997_v43, %v683_v20  ;;  %v3950_v44 = vld [vmem:[#allocation23_spill] sm:$0xff]  ;;  %v3951_v20 = vld [vmem:[#allocation26_spill] sm:$0xff] }
 0x16e   :  { %2380 = vtanh.bf16 %v783_v46  ;;  %v750_v32 = vadd.f32 %v2997_v43, %v686_v50  ;;  %v790_v47 = vpack.c.bf16 %v757_v29, %v754_v21  ;;  %v696_v7 = vmul.f32 %v2766_v40, %v2971_v9  ;;  %v3949_v46 = vld [vmem:[#allocation25_spill] sm:$0xff]  ;;  %v3952_v29 = vld [vmem:[#allocation28_spill] sm:$0xff] }
 0x16f   :  { %v699_v54 = vmul.f32 %v2780_v3, %v2971_v9  ;;  %v782_v4 = vpack.c.bf16 %v743_v18, %v740_v11  ;;  %v682_v28 = vmul.f32 %v2966_v19, %v2776_v53  ;;  %v685_v12 = vmul.f32 %v2966_v19, %v2788_v15 }
 0x170   :  { %v689_v61 = vmul.f32 %v2969_v2, %v2829_v34  ;;  %v786_v57 = vpack.c.bf16 %v750_v32, %v747_v22  ;;  %v692_v40 = vmul.f32 %v2969_v2, %v2850_v51  ;;  %v666_v3 = vmul.f32 %v2971_v9, %v2703_v60  ;;  %v3953_v32 = vld [vmem:[#allocation30_spill] sm:$0xff] }
 0x171   :  { %v669_v38 = vmul.f32 %v2971_v9, %v2719_v6  ;;  %v760_v53 = vadd.f32 %v2999_v37, %v696_v7  ;;  %v763_v15 = vadd.f32 %v2999_v37, %v699_v54  ;;  %v672_v34 = vmul.f32 %v2694_v55, %v2971_v9  ;;  %v3954_v7 = vld [vmem:[#allocation10_spill] sm:$0xff] }
 0x172   :  { %v675_v8 = vmul.f32 %v2710_v1, %v2971_v9  ;;  %v3945_v51 = vmov 0   ;;  %2382 = vtanh.bf16 %v790_v47  ;;  %v746_v60 = vadd.f32 %v2994_v36, %v682_v28 }
 0x173   :  { %v3088_v6 = vadd.f32 %v2999_v37, %v666_v3  ;;  %v3091_v24 = vadd.f32 %v2999_v37, %v669_v38  ;;  %2384 = vtanh.bf16 %v782_v4  ;;  %v749_v55 = vadd.f32 %v2994_v36, %v685_v12  ;;  %v3955_v4 = vld [vmem:[#allocation11_spill] sm:$0xff]  ;;  %v3957_v3 = vld [vmem:[#allocation13_spill] sm:$0xff] }
 0x174   :  { %v3096_v1 = vadd.f32 %v2999_v37, %v672_v34  ;;  %v3099_v0 = vadd.f32 %v2999_v37, %v675_v8  ;;  %2386 = vtanh.bf16 %v786_v57  ;;  %v753_v48 = vadd.f32 %v2997_v43, %v689_v61 }
 0x175   :  { %v756_v45 = vadd.f32 %v2997_v43, %v692_v40  ;;  %v793_v13 = vpack.c.bf16 %v763_v15, %v760_v53  ;;  %v785_v52 = vpack.c.bf16 %v749_v55, %v746_v60  ;;  %v705_v23 = vmul.f32 %v2971_v9, %v3949_v46  ;;  %v3959_v15 = vld [vmem:[#allocation24_spill] sm:$0xff]  ;;  %v3961_v55 = vld [vmem:[#allocation29_spill] sm:$0xff] }
 0x176   :  { %v2369_v58 = vpop.eup %2368  ;;  %v781_v56 = vpack.c.bf16 %v3099_v0, %v3096_v1  ;;  %v688_v59 = vmul.f32 %v2966_v19, %v3950_v44  ;;  %v691_v21 = vmul.f32 %v2966_v19, %v3951_v20  ;;  %v695_v50 = vmul.f32 %v2969_v2, %v3952_v29  ;;  %v3965_v46 = vld [vmem:[#allocation16_spill] sm:$0xff] }
 0x177   :  { %v2371_v42 = vpop.eup %2370  ;;  %1144 = vmatprep.mubr.bf16.mxu0 %v2369_v58  ;;  %v789_v30 = vpack.c.bf16 %v756_v45, %v753_v48  ;;  %2388 = vtanh.bf16 %v793_v13  ;;  %v769_v22 = vadd.f32 %v2999_v37, %v705_v23  ;;  %v698_v47 = vmul.f32 %v2969_v2, %v3953_v32  ;;  %v3962_v45 = vld [vmem:[#allocation32_spill] sm:$0xff] }
 0x178   :  { %v2373_v14 = vpop.eup %2372  ;;  %1278 = vmatmul.mubr.bf16.vlgmr.msra.gmra.mxu1 %v2371_v42  ;;  %2390 = vtanh.bf16 %v785_v52  ;;  %v752_v54 = vadd.f32 %v2994_v36, %v688_v59  ;;  %v755_v58 = vadd.f32 %v2994_v36, %v691_v21  ;;  %v759_v28 = vadd.f32 %v2997_v43, %v695_v50  ;;  %v3956_v42 = vld [vmem:[#allocation12_spill] sm:$0xff]  ;;  %v3966_v59 = vld [vmem:[#allocation15_spill] sm:$0xff]  ;;  %v3967_v21 = vld [vmem:[#allocation17_spill] sm:$0xff] }
 0x179   :  { %v2375_v16 = vpop.eup %2374  ;;  %1145 = vmatmul.mubr.bf16.vlgmr.msra.gmra.mxu0 %v2373_v14  ;;  %1287 = vmatprep.mubr.bf16.mxu1 %v3945_v51  ;;  %2392 = vtanh.bf16 %v789_v30  ;;  %v762_v12 = vadd.f32 %v2997_v43, %v698_v47  ;;  %v3958_v14 = vld [vmem:[#allocation21_spill] sm:$0xff]  ;;  %v711_v34 = vmul.f32 %v3959_v15, %v2971_v9  ;;  %v697_v48 = vmul.f32 %v2966_v19, %v3961_v55  ;;  %v3964_v30 = vld [vmem:[#allocation14_spill] sm:$0xff]  ;;  %v3968_v50 = vld [vmem:[#allocation31_spill] sm:$0xff] }
 0x17a   :  { %1226 = vmatpush1.bf16.msra.mxu0 %v2661_v33  ;;  %1154 = vmatprep.mubr.bf16.mxu0 %v2375_v16  ;;  %v778_v33 = vpack.c.bf16 %v3091_v24, %v3088_v6  ;;  %v2377_v63 = vpop.eup %2376  ;;  %v788_v57 = vpack.c.bf16 %v755_v58, %v752_v54  ;;  %v708_v53 = vmul.f32 %v3958_v14, %v2971_v9  ;;  %v3960_v16 = vld [vmem:[#allocation27_spill] sm:$0xff] }
 0x17b   :  { %1227 = vmatprep.subr.bf16.mxu0 %v2665_v35  ;;  %v3948_v35 = vld [vmem:[#allocation22_spill] sm:$0xff]  ;;  %v2379_v49 = vpop.eup %2378  ;;  %v792_v38 = vpack.c.bf16 %v762_v12, %v759_v28  ;;  %v694_v60 = vmul.f32 %v2966_v19, %v3960_v16  ;;  %v701_v13 = vmul.f32 %v2969_v2, %v3962_v45  ;;  %v3971_v54 = vld [vmem:[#allocation19_spill] sm:$0xff] }
 0x17c   :  { %v702_v27 = vmul.f32 %v2971_v9, %v3948_v35  ;;  %v2381_v11 = vpop.eup %2380  ;;  %v772_v52 = vadd.f32 %v2999_v37, %v708_v53  ;;  %v775_v9 = vadd.f32 %v2999_v37, %v711_v34 }
 0x17d   :  { %v758_v35 = vadd.f32 %v2994_v36, %v694_v60  ;;  %v765_v23 = vadd.f32 %v2997_v43, %v701_v13 }
 0x17e   :  { %1228 = vmatpush1.bf16.msra.mxu0 %v3946_v25  ;;  %v766_v18 = vadd.f32 %v2999_v37, %v702_v27  ;;  %v761_v27 = vadd.f32 %v2994_v36, %v697_v48  ;;  %v799_v44 = vpack.c.bf16 %v775_v9, %v772_v52 }
 0x17f   :  { %1229 = vmatprep.subr.bf16.mxu0 %v3947_v10 }
 0x180   :  { %1288 = vmatmul.mubr.bf16.gmra.mxu1 %v2377_v63  ;;  %v796_v61 = vpack.c.bf16 %v769_v22, %v766_v18  ;;  %v2383_v40 = vpop.eup %2382  ;;  %v3963_v63 = vld [vmem:[#allocation34_spill] sm:$0xff]  ;;  %v791_v37 = vpack.c.bf16 %v761_v27, %v758_v35  ;;  %v3969_v18 = vld [vmem:[#allocation33_spill] sm:$0xff] }
 0x181   :  { %1155 = vmatmul.mubr.bf16.gmra.mxu0 %v2379_v49  ;;  %1297 = vmatprep.mubr.bf16.mxu1 %v3945_v51  ;;  %v2385_v8 = vpop.eup %2384  ;;  %v704_v10 = vmul.f32 %v2969_v2, %v3963_v63  ;;  %v703_v22 = vmul.f32 %v2966_v19, %v3969_v18 }
 0x182   :  { %1164 = vmatprep.mubr.bf16.mxu0 %v2381_v11  ;;  %1230 = vmatpush1.bf16.msra.mxu0 %v3954_v7  ;;  %v2387_v25 = vpop.eup %2386  ;;  %2394 = vtanh.bf16 %v796_v61  ;;  %v700_v11 = vmul.f32 %v2966_v19, %v3968_v50  ;;  %v3970_v7 = vld [vmem:[#allocation18_spill] sm:$0xff]  ;;  %v3973_v61 = vld [vmem:[#allocation35_spill] sm:$0xff] }
 0x183   :  { %1231 = vmatprep.subr.bf16.mxu0 %v3955_v4  ;;  %2396 = vtanh.bf16 %v788_v57  ;;  %v768_v49 = vadd.f32 %v2997_v43, %v704_v10  ;;  %v767_v47 = vadd.f32 %v2994_v36, %v703_v22  ;;  %v3972_v4 = vld [vmem:[#allocation20_spill] sm:$0xff]  ;;  %v2349_v22 = vld [vmem:[#allocation4 + $0x30] sm:$0xff]  }
 0x184   :  { %2398 = vtanh.bf16 %v792_v38  ;;  %v764_v43 = vadd.f32 %v2994_v36, %v700_v11  ;;  %v3974_v57 = vld [vmem:[#allocation36_spill] sm:$0xff] }
 0x185   :  { %v2389_v2 = vpop.eup %2388  ;;  %v795_v20 = vpack.c.bf16 %v768_v49, %v765_v23  ;;  %2400 = vtanh.bf16 %v799_v44 }
 0x186   :  { %1232 = vmatpush1.bf16.msra.mxu0 %v3956_v42  ;;  %v2391_v29 = vpop.eup %2390  ;;  %2402 = vtanh.bf16 %v791_v37  ;;  %v794_v58 = vpack.c.bf16 %v767_v47, %v764_v43  ;;  %v706_v42 = vmul.f32 %v2966_v19, %v3973_v61  ;;  %v2353_v61 = vld [vmem:[#allocation4 + $0x20] sm:$0xff]  }
 0x187   :  { %1233 = vmatprep.subr.bf16.mxu0 %v3957_v3  ;;  %v2393_v32 = vpop.eup %2392  ;;  %2404 = vtanh.bf16 %v795_v20  ;;  %v2346_v20 = vld [vmem:[#allocation4 + $0x78] sm:$0xff]  }
 0x188   :  { %1298 = vmatmul.mubr.bf16.gmra.mxu1 %v2383_v40  ;;  %v709_v40 = vmul.f32 %v2966_v19, %v3974_v57  ;;  %2406 = vtanh.bf16 %v794_v58  ;;  %v770_v38 = vadd.f32 %v2994_v36, %v706_v42  ;;  %2150 = vmatprep.subr.bf16.mxu1 %v2346_v20  ;;  %v2352_v58 = vld [vmem:[#allocation4 + $0x60] sm:$0xff]   ;;  %v2354_v42 = vld [vmem:[#allocation4 + $0x58] sm:$0xff]  }
 0x189   :  { %1165 = vmatmul.mubr.bf16.gmra.mxu0 %v2385_v8  ;;  %1307 = vmatprep.mubr.bf16.mxu1 %v3945_v51  ;;  %2408 = vtanh.bf16 %v798_v17  ;;  %v2360_v20 = vld [vmem:[#allocation4 + $0x40] sm:$0xff]  }
 0x18a   :  { %1174 = vmatprep.mubr.bf16.mxu0 %v2387_v25  ;;  %1234 = vmatpush1.bf16.msra.mxu0 %v3964_v30  ;;  %v773_v14 = vadd.f32 %v2994_v36, %v709_v40 }
 0x18b   :  { %1235 = vmatprep.subr.bf16.mxu0 %v3965_v46 }
 0x18c   :  { %v797_v53 = vpack.c.bf16 %v773_v14, %v770_v38  ;;  %v2355_v38 = vld [vmem:[#allocation4 + $0x18] sm:$0xff]   ;;  %v2356_v14 = vld [vmem:[#allocation4 + $0x50] sm:$0xff]  }
 0x18e   :  { %1236 = vmatpush1.bf16.msra.mxu0 %v3966_v59  ;;  %2410 = vtanh.bf16 %v797_v53 }
 0x18f   :  { %1237 = vmatprep.subr.bf16.mxu0 %v3967_v21  ;;  %2412 = vtanh.bf16 %v778_v33  ;;  %v2347_v21 = vld [vmem:[#allocation4 + $0x38] sm:$0xff]  }
 0x190   :  { %1308 = vmatmul.mubr.bf16.gmra.mxu1 %v2389_v2  ;;  %v2395_v28 = vpop.eup %2394  ;;  %2414 = vtanh.bf16 %v781_v56 }
 0x191   :  { %1175 = vmatmul.mubr.bf16.gmra.mxu0 %v2391_v29  ;;  %1317 = vmatprep.mubr.bf16.mxu1 %v3945_v51  ;;  %v2397_v12 = vpop.eup %2396  ;;  %v2348_v29 = vld [vmem:[#allocation4 + $0x70] sm:$0xff]  }
 0x192   :  { %1184 = vmatprep.mubr.bf16.mxu0 %v2393_v32  ;;  %1238 = vmatpush1.bf16.msra.mxu0 %v3970_v7  ;;  %v2399_v3 = vpop.eup %2398  ;;  %v2350_v32 = vld [vmem:[#allocation4 + $0x68] sm:$0xff]  }
 0x193   :  { %1239 = vmatprep.subr.bf16.mxu0 %v3971_v54  ;;  %v2401_v15 = vpop.eup %2400  ;;  %2151 = vmatpush3.bf16.msra.mxu1 %v2347_v21  ;;  %v2351_v54 = vld [vmem:[#allocation4 + $0x28] sm:$0xff]  }
 0x194   :  { %v2403_v34 = vpop.eup %2402  ;;  %2152 = vmatprep.subr.bf16.mxu1 %v2348_v29 }
 0x195   :  { %v2405_v8 = vpop.eup %2404 }
 0x196   :  { %1240 = vmatpush1.bf16.msra.mxu0 %v3972_v4  ;;  %v2407_v19 = vpop.eup %2406 }
 0x197   :  { %v2409_v16 = vpop.eup %2408  ;;  %2153 = vmatpush3.bf16.msra.mxu1 %v2349_v22 }
 0x198   :  { %1318 = vmatmul.mubr.bf16.gmra.mxu1 %v2395_v28  ;;  %2154 = vmatprep.subr.bf16.mxu1 %v2350_v32  ;;  %v2361_v32 = vld [vmem:[#allocation4] sm:$0xff]  }
 0x199   :  { %1185 = vmatmul.mubr.bf16.gmra.mxu0 %v2397_v12  ;;  %1327 = vmatprep.mubr.bf16.mxu1 %v3945_v51 }
 0x19a   :  { %1194 = vmatprep.mubr.bf16.mxu0 %v2399_v3 }
 0x19b   :  { %2155 = vmatpush3.bf16.msra.mxu1 %v2351_v54 }
 0x19c   :  { %v2411_v36 = vpop.eup %2410  ;;  %2156 = vmatprep.subr.bf16.mxu1 %v2352_v58 }
 0x19d   :  { %v2413_v62 = vpop.eup %2412 }
 0x19e   :  { %v2415_v5 = vpop.eup %2414 }
 0x19f   :  { %2157 = vmatpush3.bf16.msra.mxu1 %v2353_v61 }
 0x1a0   :  { %1328 = vmatmul.mubr.bf16.gmra.mxu1 %v2401_v15  ;;  %2158 = vmatprep.subr.bf16.mxu1 %v2354_v42 }
 0x1a1   :  { %1195 = vmatmul.mubr.bf16.gmra.mxu0 %v2403_v34 }
 0x1a2   :  { %1204 = vmatprep.mubr.bf16.mxu0 %v2405_v8  ;;  %v2357_v8 = vld [vmem:[#allocation4 + $0x10] sm:$0xff]  }
 0x1a3   :  { %2159 = vmatpush3.bf16.msra.mxu1 %v2355_v38 }
 0x1a4   :  { %2160 = vmatprep.subr.bf16.mxu1 %v2356_v14 }
 0x1a7   :  { %2161 = vmatpush3.bf16.msra.mxu1 %v2357_v8 }
 0x1a9   :  { %1205 = vmatmul.mubr.bf16.gmra.mxu0 %v2407_v19  ;;  %v2358_v19 = vld [vmem:[#allocation4 + $0x48] sm:$0xff]  }
 0x1aa   :  { %1214 = vmatprep.mubr.bf16.mxu0 %v2409_v16  ;;  %2162 = vmatprep.subr.bf16.mxu1 %v2358_v19 }
 0x1b1   :  { %1215 = vmatmul.mubr.bf16.gmra.mxu0 %v2411_v36 }
 0x1b2   :  { %1257 = vmatprep.mubr.bf16.mxu0 %v3945_v51 }
 0x1b9   :  { %1258 = vmatmul.mubr.bf16.vlgmr.msra.gmra.mxu0 %v2413_v62 }
 0x1ba   :  { %1267 = vmatprep.mubr.bf16.mxu0 %v3945_v51 }
 0x1c1   :  { %1268 = vmatmul.mubr.bf16.gmra.mxu0 %v2415_v5  ;;  %v2359_v5 = vld [vmem:[#allocation4 + $0x8] sm:$0xff]  }
 0x1c2   :  { %2163 = vmatpush3.bf16.msra.mxu1 %v2359_v5 }
 0x1c3   :  { %2164 = vmatprep.subr.bf16.mxu1 %v2360_v20 }
 0x1c6   :  { %2165 = vmatpush3.bf16.msra.mxu1 %v2361_v32 }
 0x238   :  { %v3192_v33 = vpop.f32.mrf.mxu1 }
 0x239   :  { %v3184_v17 = vpop.f32.mrf.mxu0 }
 0x23a   :  { %v3198_v0 = vpop.f32.mrf.mxu1 }
 0x23b   :  { %v3186_v60 = vpop.f32.mrf.mxu0 }
 0x23c   :  { %v3204_v45 = vpop.f32.mrf.mxu1 }
 0x23d   :  { %v3188_v6 = vpop.f32.mrf.mxu0 }
 0x23e   :  { %v3210_v52 = vpop.f32.mrf.mxu1 }
 0x23f   :  { %v3190_v24 = vpop.f32.mrf.mxu0 }
 0x240   :  { %v3216_v10 = vpop.f32.mrf.mxu1 }
 0x241   :  { %v3194_v55 = vpop.f32.mrf.mxu0 }
 0x242   :  { %v3222_v27 = vpop.f32.mrf.mxu1 }
 0x243   :  { %v3196_v1 = vpop.f32.mrf.mxu0 }
 0x244   :  { %v3228_v49 = vpop.f32.mrf.mxu1 }
 0x245   :  { %v3200_v56 = vpop.f32.mrf.mxu0 }
 0x246   :  { %v3234_v59 = vpop.f32.mrf.mxu1 }
 0x247   :  { %v3202_v48 = vpop.f32.mrf.mxu0 }
 0x248   :  { %v3240_v11 = vpop.f32.mrf.mxu1 }
 0x249   :  { %v3206_v13 = vpop.f32.mrf.mxu0 }
 0x24a   :  { %v3246_v47 = vpop.f32.mrf.mxu1 }
 0x24b   :  { %v3208_v25 = vpop.f32.mrf.mxu0 }
 0x24c   :  { %v3252_v28 = vpop.f32.mrf.mxu1 }
 0x24d   :  { %v3212_v9 = vpop.f32.mrf.mxu0 }
 0x24e   :  { %v3258_v40 = vpop.f32.mrf.mxu1 }
 0x24f   :  { %v3214_v63 = vpop.f32.mrf.mxu0 }
 0x250   :  { %v3264_v15 = vpop.f32.mrf.mxu1 }
 0x251   :  { %v3218_v30 = vpop.f32.mrf.mxu0 }
 0x252   :  { %v3270_v36 = vpop.f32.mrf.mxu1 }
 0x253   :  { %v3220_v35 = vpop.f32.mrf.mxu0 }
 0x254   :  { %v3276_v29 = vpop.f32.mrf.mxu1 }
 0x255   :  { %v3224_v46 = vpop.f32.mrf.mxu0 }
 0x256   :  { %v3278_v58 = vpop.f32.mrf.mxu1 }
 0x257   :  { %v3226_v23 = vpop.f32.mrf.mxu0 }
 0x258   :  { %v3286_v8 = vpop.f32.mrf.mxu1 }
 0x259   :  { %v3230_v44 = vpop.f32.mrf.mxu0 }
 0x25b   :  { %v3232_v37 = vpop.f32.mrf.mxu0 }
 0x25d   :  { %v3236_v2 = vpop.f32.mrf.mxu0 }
 0x25f   :  { %v3238_v50 = vpop.f32.mrf.mxu0 }
 0x261   :  { %v3242_v18 = vpop.f32.mrf.mxu0 }
 0x263   :  { %v3244_v43 = vpop.f32.mrf.mxu0 }
 0x265   :  { %v3248_v7 = vpop.f32.mrf.mxu0 }
 0x267   :  { %v3250_v4 = vpop.f32.mrf.mxu0 }
 0x269   :  { %v3254_v12 = vpop.f32.mrf.mxu0 }
 0x26b   :  { %v3256_v57 = vpop.f32.mrf.mxu0 }
 0x26d   :  { %v3260_v3 = vpop.f32.mrf.mxu0 }
 0x26f   :  { %v3262_v53 = vpop.f32.mrf.mxu0 }
 0x271   :  { %v3266_v34 = vpop.f32.mrf.mxu0 }
 0x273   :  { %v3268_v16 = vpop.f32.mrf.mxu0 }
 0x275   :  { %v3272_v62 = vpop.f32.mrf.mxu0 }
 0x277   :  { %v3274_v21 = vpop.f32.mrf.mxu0 }
 0x279   :  { %v1259_v22 = vpop.f32.mrf.mxu0 }
 0x27a   :  { %v3284_v38 = vadd.f32 %v1259_v22, %v3184_v17 }
 0x27b   :  { %v1261_v54 = vpop.f32.mrf.mxu0 }
 0x27c   :  { %3976 = vst [vmem:[#allocation9_spill] sm:$0xff] %v3284_v38  ;;  %v3292_v5 = vadd.f32 %v1261_v54, %v3186_v60  ;;  %v1380_v17 = vmul.f32 %v3284_v38, %v3284_v38 }
 0x27d   :  { %v1263_v61 = vpop.f32.mrf.mxu0 }
 0x27e   :  { %v3281_v42 = vadd.f32 %v1263_v61, %v3188_v6  ;;  %v3303_v61 = vpop.f32.mrf.mxu1 }
 0x27f   :  { %v1265_v14 = vpop.f32.mrf.mxu0 }
 0x280   :  { %3975 = vst [vmem:[#allocation8_spill] sm:$0xff] %v3281_v42  ;;  %v3289_v19 = vadd.f32 %v1265_v14, %v3190_v24  ;;  %v1382_v20 = vmul.f32 %v3281_v42, %v3281_v42  ;;  %v1338_v60 = vadd.f32 %v3281_v42, %v3284_v38 }
 0x281   :  { %v1269_v41 = vpop.f32.mrf.mxu0 }
 0x282   :  { %3977 = vst [vmem:[#allocation22_spill] sm:$0xff] %v3289_v19  ;;  %v3297_v32 = vadd.f32 %v1269_v41, %v3194_v55  ;;  %v1383_v6 = vmul.f32 %v3289_v19, %v3289_v19  ;;  %v3314_v41 = vadd.f32 %v3192_v33, %v3206_v13  ;;  %v1381_v55 = vmul.f32 %v3292_v5, %v3292_v5 }
 0x283   :  { %v1271_v22 = vpop.f32.mrf.mxu0  ;;  %v1412_v14 = vadd.f32 %v1382_v20, %v1380_v17  ;;  %v1359_v31 = vadd.f32 %v3289_v19, %v3292_v5  ;;  %v3328_v33 = vadd.f32 %v3198_v0, %v3208_v25  ;;  %v3332_v13 = vadd.f32 %v3204_v45, %v3212_v9  ;;  %v3334_v19 = vpop.f32.mrf.mxu1 }
 0x284   :  { %3978 = vst [vmem:[#allocation25_spill] sm:$0xff] %v3297_v32  ;;  %v1384_v24 = vmul.f32 %v3297_v32, %v3297_v32  ;;  %v3310_v54 = vadd.f32 %v1271_v22, %v3196_v1  ;;  %v1339_v42 = vadd.f32 %v1338_v60, %v3297_v32  ;;  %v1433_v20 = vadd.f32 %v1383_v6, %v1381_v55 }
 0x285   :  { %v1273_v51 = vpop.f32.mrf.mxu0  ;;  %v1388_v0 = vmul.f32 %v3314_v41, %v3314_v41  ;;  %v3347_v45 = vadd.f32 %v3210_v52, %v3214_v63  ;;  %v3351_v25 = vadd.f32 %v3216_v10, %v3218_v30  ;;  %v1390_v52 = vmul.f32 %v3332_v13, %v3332_v13  ;;  %v1325_v30 = vpop.f32.mrf.mxu1 }
 0x286   :  { %v1385_v38 = vmul.f32 %v3310_v54, %v3310_v54  ;;  %v3324_v1 = vadd.f32 %v1273_v51, %v3200_v56  ;;  %v1413_v17 = vadd.f32 %v1412_v14, %v1384_v24  ;;  %v1360_v60 = vadd.f32 %v1359_v31, %v3310_v54 }
 0x287   :  { %v1275_v22 = vpop.f32.mrf.mxu0  ;;  %v1389_v24 = vmul.f32 %v3328_v33, %v3328_v33  ;;  %v3363_v63 = vadd.f32 %v3222_v27, %v3220_v35  ;;  %v3367_v10 = vadd.f32 %v3228_v49, %v3224_v46  ;;  %v3377_v35 = vadd.f32 %v3234_v59, %v3226_v23  ;;  %v1329_v59 = vpop.f32.mrf.mxu1 }
 0x288   :  { %v1340_v32 = vadd.f32 %v1339_v42, %v3324_v1  ;;  %v1386_v51 = vmul.f32 %v3324_v1, %v3324_v1  ;;  %v3341_v56 = vadd.f32 %v1275_v22, %v3202_v48  ;;  %v1434_v31 = vadd.f32 %v1433_v20, %v1385_v38 }
 0x289   :  { %v1391_v20 = vmul.f32 %v3347_v45, %v3347_v45  ;;  %v3381_v27 = vadd.f32 %v3240_v11, %v3230_v44  ;;  %v3391_v23 = vadd.f32 %v3246_v47, %v3232_v37  ;;  %v3395_v44 = vadd.f32 %v3252_v28, %v3236_v2 }
 0x28a   :  { %v1341_v9 = vadd.f32 %v1340_v32, %v3314_v41  ;;  %v1414_v42 = vadd.f32 %v1413_v17, %v1386_v51  ;;  %v1361_v6 = vadd.f32 %v1360_v60, %v3341_v56  ;;  %v1387_v48 = vmul.f32 %v3341_v56, %v3341_v56 }
 0x28b   :  { %v1392_v17 = vmul.f32 %v3351_v25, %v3351_v25  ;;  %v1393_v51 = vmul.f32 %v3363_v63, %v3363_v63  ;;  %v3405_v37 = vadd.f32 %v3258_v40, %v3238_v50  ;;  %v3409_v2 = vadd.f32 %v3264_v15, %v3242_v18  ;;  %v1331_v40 = vpop.f32.mrf.mxu1 }
 0x28c   :  { %v1342_v38 = vadd.f32 %v1341_v9, %v3332_v13  ;;  %v1415_v32 = vadd.f32 %v1414_v42, %v1388_v0  ;;  %v1362_v55 = vadd.f32 %v1361_v6, %v3328_v33  ;;  %v1435_v14 = vadd.f32 %v1434_v31, %v1387_v48 }
 0x28d   :  { %v1394_v0 = vmul.f32 %v3367_v10, %v3367_v10  ;;  %v1395_v6 = vmul.f32 %v3377_v35, %v3377_v35  ;;  %v1396_v48 = vmul.f32 %v3381_v27, %v3381_v27  ;;  %v3419_v50 = vadd.f32 %v3270_v36, %v3244_v43 }
 0x28e   :  { %v1343_v46 = vadd.f32 %v1342_v38, %v3351_v25  ;;  %v1416_v49 = vadd.f32 %v1415_v32, %v1390_v52  ;;  %v1363_v22 = vadd.f32 %v1362_v55, %v3347_v45  ;;  %v1436_v60 = vadd.f32 %v1435_v14, %v1389_v24 }
 0x28f   :  { %v1397_v38 = vmul.f32 %v3391_v23, %v3391_v23  ;;  %v1398_v32 = vmul.f32 %v3395_v44, %v3395_v44  ;;  %v3423_v18 = vadd.f32 %v3276_v29, %v3248_v7  ;;  %v3433_v43 = vadd.f32 %v3278_v58, %v3250_v4  ;;  %v1333_v58 = vpop.f32.mrf.mxu1 }
 0x290   :  { %v1344_v11 = vadd.f32 %v1343_v46, %v3367_v10  ;;  %v1417_v31 = vadd.f32 %v1416_v49, %v1392_v17  ;;  %v1364_v9 = vadd.f32 %v1363_v22, %v3363_v63  ;;  %v1437_v42 = vadd.f32 %v1436_v60, %v1391_v20 }
 0x291   :  { %v1399_v17 = vmul.f32 %v3405_v37, %v3405_v37  ;;  %v1400_v46 = vmul.f32 %v3409_v2, %v3409_v2  ;;  %v3437_v7 = vadd.f32 %v3286_v8, %v3254_v12  ;;  %v1401_v60 = vmul.f32 %v3419_v50, %v3419_v50 }
 0x292   :  { %v1345_v47 = vadd.f32 %v1344_v11, %v3381_v27  ;;  %v1418_v28 = vadd.f32 %v1417_v31, %v1394_v0  ;;  %v1365_v24 = vadd.f32 %v1364_v9, %v3377_v35  ;;  %v1438_v52 = vadd.f32 %v1437_v42, %v1393_v51 }
 0x293   :  { %v1402_v51 = vmul.f32 %v3423_v18, %v3423_v18  ;;  %v3447_v4 = vadd.f32 %v3303_v61, %v3256_v57  ;;  %v3451_v12 = vadd.f32 %v3334_v19, %v3260_v3  ;;  %v1403_v9 = vmul.f32 %v3433_v43, %v3433_v43 }
 0x294   :  { %v1346_v15 = vadd.f32 %v1345_v47, %v3395_v44  ;;  %v1419_v55 = vadd.f32 %v1418_v28, %v1396_v48  ;;  %v1366_v14 = vadd.f32 %v1365_v24, %v3391_v23  ;;  %v1439_v20 = vadd.f32 %v1438_v52, %v1395_v6 }
 0x295   :  { %v1404_v42 = vmul.f32 %v3437_v7, %v3437_v7  ;;  %v3460_v57 = vadd.f32 %v1325_v30, %v3262_v53  ;;  %v3463_v61 = vadd.f32 %v1329_v59, %v3266_v34  ;;  %v1405_v47 = vmul.f32 %v3447_v4, %v3447_v4  ;;  %v1335_v34 = vpop.f32.mrf.mxu1 }
 0x296   :  { %v1347_v36 = vadd.f32 %v1346_v15, %v3409_v2  ;;  %v1420_v29 = vadd.f32 %v1419_v55, %v1398_v32  ;;  %v1367_v49 = vadd.f32 %v1366_v14, %v3405_v37  ;;  %v1440_v22 = vadd.f32 %v1439_v20, %v1397_v38 }
 0x297   :  { %v1406_v28 = vmul.f32 %v3451_v12, %v3451_v12  ;;  %v3472_v24 = vadd.f32 %v1331_v40, %v3268_v16  ;;  %v3475_v53 = vadd.f32 %v1333_v58, %v3272_v62  ;;  %v1407_v32 = vmul.f32 %v3460_v57, %v3460_v57 }
 0x298   :  { %v1348_v8 = vadd.f32 %v1347_v36, %v3423_v18  ;;  %v1421_v0 = vadd.f32 %v1420_v29, %v1400_v46  ;;  %v1368_v11 = vadd.f32 %v1367_v49, %v3419_v50  ;;  %v1441_v31 = vadd.f32 %v1440_v22, %v1399_v17 }
 0x299   :  { %v1408_v15 = vmul.f32 %v3463_v61, %v3463_v61  ;;  %v3484_v55 = vadd.f32 %v1335_v34, %v3274_v21  ;;  %v1409_v20 = vmul.f32 %v3472_v24, %v3472_v24  ;;  %v1410_v17 = vmul.f32 %v3475_v53, %v3475_v53 }
 0x29a   :  { %v1349_v3 = vadd.f32 %v1348_v8, %v3437_v7  ;;  %v1422_v19 = vadd.f32 %v1421_v0, %v1402_v51  ;;  %v1369_v6 = vadd.f32 %v1368_v11, %v3433_v43  ;;  %v1442_v48 = vadd.f32 %v1441_v31, %v1401_v60 }
 0x29b   :  { %v1411_v21 = vmul.f32 %v3484_v55, %v3484_v55 }
 0x29c   :  { %v1350_v30 = vadd.f32 %v1349_v3, %v3451_v12  ;;  %v1423_v59 = vadd.f32 %v1422_v19, %v1404_v42  ;;  %v1370_v52 = vadd.f32 %v1369_v6, %v3447_v4  ;;  %v1443_v38 = vadd.f32 %v1442_v48, %v1403_v9 }
 0x29e   :  { %v1351_v16 = vadd.f32 %v1350_v30, %v3463_v61  ;;  %v1424_v62 = vadd.f32 %v1423_v59, %v1406_v28  ;;  %v1371_v40 = vadd.f32 %v1370_v52, %v3460_v57  ;;  %v1444_v14 = vadd.f32 %v1443_v38, %v1405_v47 }
 0x2a0   :  { %v1352_v46 = vadd.f32 %v1351_v16, %v3475_v53  ;;  %v1425_v36 = vadd.f32 %v1424_v62, %v1408_v15  ;;  %v1372_v29 = vadd.f32 %v1371_v40, %v3472_v24  ;;  %v1445_v49 = vadd.f32 %v1444_v14, %v1407_v32 }
 0x2a2   :  { %v1353_v22 = vrot.slane %v1352_v46, 4  ;;  %v1426_v60 = vadd.f32 %v1425_v36, %v1410_v17  ;;  %v1373_v51 = vadd.f32 %v1372_v29, %v3484_v55  ;;  %v1446_v58 = vadd.f32 %v1445_v49, %v1409_v20 }
 0x2a4   :  { %v1354_v8 = vadd.f32 %v1353_v22, %v1352_v46  ;;  %v1427_v0 = vrot.slane %v1426_v60, 4  ;;  %v1374_v11 = vrot.slane %v1373_v51, 4  ;;  %v1447_v31 = vadd.f32 %v1446_v58, %v1411_v21 }
 0x2a6   :  { %v1355_v9 = vrot.slane %v1354_v8, 2  ;;  %v1428_v42 = vadd.f32 %v1427_v0, %v1426_v60  ;;  %v1375_v3 = vadd.f32 %v1374_v11, %v1373_v51  ;;  %v1448_v19 = vrot.slane %v1447_v31, 4 }
 0x2a8   :  { %v1356_v6 = vadd.f32 %v1355_v9, %v1354_v8  ;;  %v1429_v48 = vrot.slane %v1428_v42, 2  ;;  %v1376_v47 = vrot.slane %v1375_v3, 2  ;;  %v1449_v28 = vadd.f32 %v1448_v19, %v1447_v31 }
 0x2aa   :  { %v1357_v34 = vrot.slane %v1356_v6, 1  ;;  %v1430_v30 = vadd.f32 %v1429_v48, %v1428_v42  ;;  %v1377_v59 = vadd.f32 %v1376_v47, %v1375_v3  ;;  %v1450_v52 = vrot.slane %v1449_v28, 2  ;;  %v1464_v3 = vld [vmem:[%s3871_s5] sm:$0x3]  ;;  %v3979_v47 = vld [vmem:[#allocation37_spill] sm:$0xff] }
 0x2ac   :  { %v1358_v38 = vadd.f32 %v1357_v34, %v1356_v6  ;;  %v1431_v32 = vrot.slane %v1430_v30, 1  ;;  %v1378_v15 = vrot.slane %v1377_v59, 1  ;;  %v1451_v16 = vadd.f32 %v1450_v52, %v1449_v28 }
 0x2ae   :  { %v1432_v62 = vadd.f32 %v1431_v32, %v1430_v30  ;;  %v1454_v40 = vmul.f32 0.0078125, %v1358_v38  ;;  %v1379_v14 = vadd.f32 %v1378_v15, %v1377_v59  ;;  %v1452_v20 = vrot.slane %v1451_v16, 1  ;;  %v1488_v38 = vld [vmem:[%s3872_s6] sm:$0x3] }
 0x2b0   :  { %v1456_v17 = vmul.f32 0.0078125, %v1432_v62  ;;  %v1458_v46 = vmul.f32 %v1454_v40, %v1454_v40  ;;  %v1453_v36 = vadd.f32 %v1452_v20, %v1451_v16  ;;  %v1455_v29 = vmul.f32 0.0078125, %v1379_v14  ;;  %v3980_v20 = vld [vmem:[#allocation22_spill] sm:$0xff] }
 0x2b2   :  { %v1460_v49 = vsub.f32 %v1456_v17, %v1458_v46  ;;  %v1457_v21 = vmul.f32 0.0078125, %v1453_v36  ;;  %v1459_v22 = vmul.f32 %v1455_v29, %v1455_v29  ;;  %v3981_v46 = vld [vmem:[#allocation9_spill] sm:$0xff] }
 0x2b4   :  { %v1462_v60 = vmax.f32 %v1460_v49, 0.0  ;;  %v1461_v51 = vsub.f32 %v1457_v21, %v1459_v22 }
 0x2b6   :  { %v1465_v58 = vadd.f32 1e-05, %v1462_v60  ;;  %v1463_v8 = vmax.f32 %v1461_v51, 0.0 }
 0x2b8   :  { %v1466_v0 = vadd.f32 1e-05, %v1463_v8  ;;  %2416 = vrsqrt.f32 %v1465_v58 }
 0x2ba   :  { %2418 = vrsqrt.f32 %v1466_v0  ;;  %v3983_v0 = vld [vmem:[#allocation25_spill] sm:$0xff] }
 0x2c5   :  { %v2417_v11 = vpop.eup %2416 }
 0x2c7   :  { %v2419_v31 = vpop.eup %2418 }
 0x2c8   :  { %v1471_v9 = vcombine.low %v2417_v11, %v2419_v31  ;;  %v3984_v31 = vmov 0  }
 0x2ca   :  { %v1478_v42 = vrot.slane %v1471_v9, %v2953_v39 }
 0x2cc   :  { %v1485_v19 = vrot.slane %v1478_v42, %v2953_v39 }
 0x2ce   :  { %v1487_v6 = vmul.f32 %v1485_v19, %v1464_v3 }
 0x2d0   :  { %v3503_v48 = vrot.slane %v1487_v6, %v2961_v26  ;;  %v3506_v28 = vrot.slane %v1487_v6, %v3979_v47 }
 0x2d2   :  { %v1500_v34 = vmul.f32 %v3503_v48, %v1454_v40  ;;  %v1501_v30 = vmul.f32 %v3506_v28, %v1455_v29  ;;  %v1528_v16 = vmul.f32 %v3506_v28, %v3341_v56  ;;  %v1522_v62 = vmul.f32 %v3506_v28, %v3292_v5 }
 0x2d3   :  { %v1524_v17 = vmul.f32 %v3506_v28, %v3980_v20  ;;  %v1521_v36 = vmul.f32 %v3503_v48, %v3981_v46  ;;  %v1526_v56 = vmul.f32 %v3506_v28, %v3310_v54  ;;  %v1525_v11 = vmul.f32 %v3503_v48, %v3983_v0 }
 0x2d4   :  { %v1504_v59 = vcombine.low %v1500_v34, %v1501_v30  ;;  %v1527_v54 = vmul.f32 %v3503_v48, %v3324_v1  ;;  %v1530_v42 = vmul.f32 %v3506_v28, %v3328_v33  ;;  %v1532_v3 = vmul.f32 %v3506_v28, %v3347_v45 }
 0x2d5   :  { %v1529_v45 = vmul.f32 %v3503_v48, %v3314_v41 }
 0x2d6   :  { %v1511_v52 = vrot.slane %v1504_v59, %v2953_v39 }
 0x2d8   :  { %v1518_v32 = vrot.slane %v1511_v52, %v2953_v39  ;;  %v3982_v39 = vld [vmem:[#allocation8_spill] sm:$0xff]  ;;  %v1531_v52 = vmul.f32 %v3503_v48, %v3332_v13 }
 0x2d9   :  { %v1523_v29 = vmul.f32 %v3503_v48, %v3982_v39  ;;  %v1540_v39 = vmul.f32 %v3506_v28, %v3405_v37  ;;  %v1539_v37 = vmul.f32 %v3503_v48, %v3395_v44 }
 0x2da   :  { %v1520_v15 = vsub.f32 %v1488_v38, %v1518_v32  ;;  %v1534_v38 = vmul.f32 %v3506_v28, %v3363_v63  ;;  %v1536_v32 = vmul.f32 %v3506_v28, %v3377_v35  ;;  %v1533_v63 = vmul.f32 %v3503_v48, %v3351_v25 }
 0x2db   :  { %v1535_v35 = vmul.f32 %v3503_v48, %v3367_v10 }
 0x2dc   :  { %v3520_v40 = vrot.slane %v1520_v15, %v2961_v26  ;;  %v3523_v14 = vrot.slane %v1520_v15, %v3979_v47 }
 0x2de   :  { %v1571_v5 = vadd.f32 %v3523_v14, %v1528_v16  ;;  %v1565_v26 = vadd.f32 %v3523_v14, %v1522_v62  ;;  %v1567_v49 = vadd.f32 %v3523_v14, %v1524_v17  ;;  %v1564_v21 = vadd.f32 %v3520_v40, %v1521_v36 }
 0x2df   :  { %v1566_v22 = vadd.f32 %v3520_v40, %v1523_v29  ;;  %v1569_v60 = vadd.f32 %v3523_v14, %v1526_v56  ;;  %v1568_v6 = vadd.f32 %v3520_v40, %v1525_v11  ;;  %v1570_v47 = vadd.f32 %v3520_v40, %v1527_v54 }
 0x2e0   :  { %v1597_v51 = vpack.c.bf16 %v1567_v49, %v1565_v26  ;;  %v1573_v30 = vadd.f32 %v3523_v14, %v1530_v42  ;;  %v1575_v1 = vadd.f32 %v3523_v14, %v1532_v3  ;;  %v1572_v16 = vadd.f32 %v3520_v40, %v1529_v45 }
 0x2e1   :  { %v1596_v58 = vpack.c.bf16 %v1566_v22, %v1564_v21  ;;  %v1599_v8 = vpack.c.bf16 %v1571_v5, %v1569_v60  ;;  %v1598_v59 = vpack.c.bf16 %v1570_v47, %v1568_v6  ;;  %v1574_v62 = vadd.f32 %v3520_v40, %v1531_v52 }
 0x2e2   :  { %v1613_v9 = vmax.bf16 %v3984_v31, %v1597_v51  ;;  %v1601_v33 = vpack.c.bf16 %v1575_v1, %v1573_v30  ;;  %v1577_v17 = vadd.f32 %v3523_v14, %v1534_v38  ;;  %v1579_v41 = vadd.f32 %v3523_v14, %v1536_v32 }
 0x2e3   :  { %v1612_v19 = vmax.bf16 %v3984_v31, %v1596_v58  ;;  %v1615_v34 = vmax.bf16 %v3984_v31, %v1599_v8  ;;  %v1614_v15 = vmax.bf16 %v3984_v31, %v1598_v59  ;;  %v1600_v13 = vpack.c.bf16 %v1574_v62, %v1572_v16 }
 0x2e4   :  { %1795 = vmatprep.mubr.bf16.mxu1 %v1613_v9  ;;  %v1617_v20 = vmax.bf16 %v3984_v31, %v1601_v33  ;;  %v1603_v46 = vpack.c.bf16 %v1579_v41, %v1577_v17  ;;  %v1538_v36 = vmul.f32 %v3506_v28, %v3391_v23  ;;  %v1576_v56 = vadd.f32 %v3520_v40, %v1533_v63 }
 0x2e5   :  { %1796 = vmatmul.mubr.bf16.vlgmr.msra.gmra.mxu1 %v1612_v19  ;;  %v1616_v29 = vmax.bf16 %v3984_v31, %v1600_v13  ;;  %v1578_v5 = vadd.f32 %v3520_v40, %v1535_v35  ;;  %v1583_v25 = vadd.f32 %v3523_v14, %v1540_v39  ;;  %v1537_v23 = vmul.f32 %v3503_v48, %v3381_v27 }
 0x2e6   :  { %1803 = vmatprep.mubr.bf16.mxu1 %v1615_v34  ;;  %v1619_v26 = vmax.bf16 %v3984_v31, %v1603_v46  ;;  %v1581_v49 = vadd.f32 %v3523_v14, %v1538_v36  ;;  %v1542_v22 = vmul.f32 %v3506_v28, %v3419_v50  ;;  %v1544_v60 = vmul.f32 %v3506_v28, %v3433_v43 }
 0x2e7   :  { %v1602_v10 = vpack.c.bf16 %v1578_v5, %v1576_v56  ;;  %v1580_v58 = vadd.f32 %v3520_v40, %v1537_v23  ;;  %v1582_v8 = vadd.f32 %v3520_v40, %v1539_v37  ;;  %v1541_v50 = vmul.f32 %v3503_v48, %v3409_v2 }
 0x2e8   :  { %v1605_v21 = vpack.c.bf16 %v1583_v25, %v1581_v49  ;;  %v1585_v11 = vadd.f32 %v3523_v14, %v1542_v22  ;;  %v1587_v27 = vadd.f32 %v3523_v14, %v1544_v60  ;;  %v1543_v43 = vmul.f32 %v3503_v48, %v3423_v18 }
 0x2e9   :  { %v1618_v51 = vmax.bf16 %v3984_v31, %v1602_v10  ;;  %v1604_v44 = vpack.c.bf16 %v1582_v8, %v1580_v58  ;;  %v1546_v9 = vmul.f32 %v3506_v28, %v3447_v4  ;;  %v1548_v42 = vmul.f32 %v3506_v28, %v3460_v57 }
 0x2ea   :  { %v1621_v0 = vmax.bf16 %v3984_v31, %v1605_v21  ;;  %v1607_v54 = vpack.c.bf16 %v1587_v27, %v1585_v11  ;;  %v1584_v19 = vadd.f32 %v3520_v40, %v1541_v50  ;;  %v1586_v6 = vadd.f32 %v3520_v40, %v1543_v43 }
 0x2eb   :  { %v1620_v3 = vmax.bf16 %v3984_v31, %v1604_v44  ;;  %v1589_v34 = vadd.f32 %v3523_v14, %v1546_v9  ;;  %v1591_v2 = vadd.f32 %v3523_v14, %v1548_v42  ;;  %v1545_v4 = vmul.f32 %v3503_v48, %v3437_v7 }
 0x2ec   :  { %v1623_v47 = vmax.bf16 %v3984_v31, %v1607_v54  ;;  %v1606_v18 = vpack.c.bf16 %v1586_v6, %v1584_v19  ;;  %v1547_v57 = vmul.f32 %v3503_v48, %v3451_v12  ;;  %v1550_v1 = vmul.f32 %v3506_v28, %v3472_v24 }
 0x2ed   :  { %1804 = vmatmul.mubr.bf16.gmra.mxu1 %v1614_v15  ;;  %v1609_v30 = vpack.c.bf16 %v1591_v2, %v1589_v34  ;;  %v1552_v59 = vmul.f32 %v3506_v28, %v3484_v55  ;;  %v1588_v45 = vadd.f32 %v3520_v40, %v1545_v4  ;;  %v1549_v24 = vmul.f32 %v3503_v48, %v3463_v61 }
 0x2ee   :  { %1811 = vmatprep.mubr.bf16.mxu1 %v1617_v20  ;;  %v1622_v33 = vmax.bf16 %v3984_v31, %v1606_v18  ;;  %v1590_v52 = vadd.f32 %v3520_v40, %v1547_v57  ;;  %v1593_v32 = vadd.f32 %v3523_v14, %v1550_v1  ;;  %v1551_v55 = vmul.f32 %v3503_v48, %v3475_v53  ;;  %v3639_v53 = vld [vmem:[%s3874_s8] ss:$0 sm:$0xff] }
 0x2ef   :  { %v1625_v38 = vmax.bf16 %v3984_v31, %v1609_v30  ;;  %v1595_v7 = vadd.f32 %v3523_v14, %v1552_v59  ;;  %v1592_v16 = vadd.f32 %v3520_v40, %v1549_v24  ;;  %v3985_v13 = vlaneseq }
 0x2f0   :  { %v1608_v12 = vpack.c.bf16 %v1590_v52, %v1588_v45  ;;  %v1594_v62 = vadd.f32 %v3520_v40, %v1551_v55 }
 0x2f1   :  { %v1611_v15 = vpack.c.bf16 %v1595_v7, %v1593_v32  ;;  %v3634_v61 = vand.u32 127, %v3985_v13 }
 0x2f2   :  { %v1624_v28 = vmax.bf16 %v3984_v31, %v1608_v12  ;;  %v1610_v14 = vpack.c.bf16 %v1594_v62, %v1592_v16 }
 0x2f3   :  { %v1627_v20 = vmax.bf16 %v3984_v31, %v1611_v15  ;;  %vm1862_vm1 = vcmp.lt.s32.totalorder %v3634_v61, 9 }
 0x2f4   :  { %v1626_v17 = vmax.bf16 %v3984_v31, %v1610_v14 }
 0x2f5   :  { %1812 = vmatmul.mubr.bf16.gmra.mxu1 %v1616_v29 }
 0x2f6   :  { %1819 = vmatprep.mubr.bf16.mxu1 %v1619_v26 }
 0x2fd   :  { %1820 = vmatmul.mubr.bf16.gmra.mxu1 %v1618_v51 }
 0x2fe   :  { %1827 = vmatprep.mubr.bf16.mxu1 %v1621_v0 }
 0x305   :  { %1828 = vmatmul.mubr.bf16.gmra.mxu1 %v1620_v3 }
 0x306   :  { %1835 = vmatprep.mubr.bf16.mxu1 %v1623_v47 }
 0x30d   :  { %1836 = vmatmul.mubr.bf16.gmra.mxu1 %v1622_v33 }
 0x30e   :  { %1843 = vmatprep.mubr.bf16.mxu1 %v1625_v38 }
 0x315   :  { %1844 = vmatmul.mubr.bf16.gmra.mxu1 %v1624_v28 }
 0x316   :  { %1851 = vmatprep.mubr.bf16.mxu1 %v1627_v20 }
 0x31d   :  { %1852 = vmatmul.mubr.bf16.gmra.mxu1 %v1626_v17 }
 0x3a5   :  { %v2166_v41 = vpop.f32.mrf.mxu1 }
 0x3a7   :  { %v2167_v46 = vpop.f32.mrf.mxu1 }
 0x3a8   :  { %v2168_v48 = vadd.f32 %v2167_v46, %v2166_v41 }
 0x3a9   :  { %v2169_v40 = vpop.f32.mrf.mxu1 }
 0x3aa   :  { %v1798_v63 = vadd.f32 %v2168_v48, %v3639_v53 }
 0x3ab   :  { %v2170_v35 = vpop.f32.mrf.mxu1 }
 0x3ac   :  { %v2171_v36 = vadd.f32 %v2170_v35, %v2169_v40  ;;  %v3645_v31 = vsel %vm1862_vm1, %v1798_v63, -1e+30 }
 0x3ad   :  { %v2172_v39 = vpop.f32.mrf.mxu1  ;;  %1879 = vmax.xlane.f32.xlu0 %v3645_v31 }
 0x3ae   :  { %v1801_v29 = vadd.f32 %v2171_v36, %v3639_v53 }
 0x3af   :  { %v2173_v56 = vpop.f32.mrf.mxu1 }
 0x3b0   :  { %v2174_v5 = vadd.f32 %v2173_v56, %v2172_v39  ;;  %v3651_v26 = vsel %vm1862_vm1, %v1801_v29, -1e+30 }
 0x3b1   :  { %v2175_v49 = vpop.f32.mrf.mxu1  ;;  %1881 = vmax.xlane.f32.xlu0 %v3651_v26 }
 0x3b2   :  { %v1806_v25 = vadd.f32 %v2174_v5, %v3639_v53 }
 0x3b3   :  { %v2176_v10 = vpop.f32.mrf.mxu1 }
 0x3b4   :  { %v2177_v21 = vadd.f32 %v2176_v10, %v2175_v49  ;;  %v3657_v23 = vsel %vm1862_vm1, %v1806_v25, -1e+30 }
 0x3b5   :  { %v2178_v37 = vpop.f32.mrf.mxu1  ;;  %1883 = vmax.xlane.f32.xlu1 %v3657_v23 }
 0x3b6   :  { %v1809_v22 = vadd.f32 %v2177_v21, %v3639_v53 }
 0x3b7   :  { %v2179_v60 = vpop.f32.mrf.mxu1 }
 0x3b8   :  { %v2180_v51 = vadd.f32 %v2179_v60, %v2178_v37  ;;  %v3663_v58 = vsel %vm1862_vm1, %v1809_v22, -1e+30 }
 0x3b9   :  { %v2181_v8 = vpop.f32.mrf.mxu1  ;;  %1885 = vmax.xlane.f32.xlu1 %v3663_v58 }
 0x3ba   :  { %v1814_v0 = vadd.f32 %v2180_v51, %v3639_v53 }
 0x3bb   :  { %v2182_v11 = vpop.f32.mrf.mxu1 }
 0x3bc   :  { %v2183_v27 = vadd.f32 %v2182_v11, %v2181_v8  ;;  %v3669_v44 = vsel %vm1862_vm1, %v1814_v0, -1e+30 }
 0x3bd   :  { %v2184_v54 = vpop.f32.mrf.mxu1  ;;  %1887 = vmax.xlane.f32.xlu0 %v3669_v44 }
 0x3be   :  { %v1817_v50 = vadd.f32 %v2183_v27, %v3639_v53 }
 0x3bf   :  { %v2185_v43 = vpop.f32.mrf.mxu1 }
 0x3c0   :  { %v2186_v9 = vadd.f32 %v2185_v43, %v2184_v54  ;;  %v3675_v42 = vsel %vm1862_vm1, %v1817_v50, -1e+30 }
 0x3c1   :  { %v2187_v3 = vpop.f32.mrf.mxu1  ;;  %1889 = vmax.xlane.f32.xlu1 %v3675_v42 }
 0x3c2   :  { %v1822_v19 = vadd.f32 %v2186_v9, %v3639_v53 }
 0x3c3   :  { %v2188_v6 = vpop.f32.mrf.mxu1 }
 0x3c4   :  { %v2189_v47 = vadd.f32 %v2188_v6, %v2187_v3  ;;  %v3681_v34 = vsel %vm1862_vm1, %v1822_v19, -1e+30 }
 0x3c5   :  { %v2190_v2 = vpop.f32.mrf.mxu1  ;;  %1891 = vmax.xlane.f32.xlu0 %v3681_v34 }
 0x3c6   :  { %v1825_v18 = vadd.f32 %v2189_v47, %v3639_v53 }
 0x3c7   :  { %v2191_v30 = vpop.f32.mrf.mxu1 }
 0x3c8   :  { %v2192_v4 = vadd.f32 %v2191_v30, %v2190_v2  ;;  %v3687_v57 = vsel %vm1862_vm1, %v1825_v18, -1e+30 }
 0x3c9   :  { %v2193_v1 = vpop.f32.mrf.mxu1  ;;  %1893 = vmax.xlane.f32.xlu1 %v3687_v57 }
 0x3ca   :  { %v1830_v59 = vadd.f32 %v2192_v4, %v3639_v53 }
 0x3cb   :  { %v2194_v33 = vpop.f32.mrf.mxu1 }
 0x3cc   :  { %v2195_v45 = vadd.f32 %v2194_v33, %v2193_v1  ;;  %v3693_v52 = vsel %vm1862_vm1, %v1830_v59, -1e+30 }
 0x3cd   :  { %v2196_v38 = vpop.f32.mrf.mxu1  ;;  %1895 = vmax.xlane.f32.xlu0 %v3693_v52 }
 0x3ce   :  { %v1833_v32 = vadd.f32 %v2195_v45, %v3639_v53 }
 0x3cf   :  { %v2197_v7 = vpop.f32.mrf.mxu1 }
 0x3d0   :  { %v2198_v12 = vadd.f32 %v2197_v7, %v2196_v38  ;;  %v3699_v15 = vsel %vm1862_vm1, %v1833_v32, -1e+30 }
 0x3d1   :  { %v2199_v24 = vpop.f32.mrf.mxu1  ;;  %1897 = vmax.xlane.f32.xlu1 %v3699_v15 }
 0x3d2   :  { %v1838_v55 = vadd.f32 %v2198_v12, %v3639_v53 }
 0x3d3   :  { %v2200_v28 = vpop.f32.mrf.mxu1 }
 0x3d4   :  { %v2201_v16 = vadd.f32 %v2200_v28, %v2199_v24  ;;  %v3705_v62 = vsel %vm1862_vm1, %v1838_v55, -1e+30 }
 0x3d5   :  { %v2202_v20 = vpop.f32.mrf.mxu1  ;;  %1899 = vmax.xlane.f32.xlu0 %v3705_v62 }
 0x3d6   :  { %v1841_v14 = vadd.f32 %v2201_v16, %v3639_v53 }
 0x3d7   :  { %v2203_v17 = vpop.f32.mrf.mxu1 }
 0x3d8   :  { %v2204_v41 = vadd.f32 %v2203_v17, %v2202_v20  ;;  %v3711_v13 = vsel %vm1862_vm1, %v1841_v14, -1e+30 }
 0x3d9   :  { %v2205_v46 = vpop.f32.mrf.mxu1  ;;  %1901 = vmax.xlane.f32.xlu1 %v3711_v13 }
 0x3da   :  { %v1846_v48 = vadd.f32 %v2204_v41, %v3639_v53 }
 0x3db   :  { %v2206_v40 = vpop.f32.mrf.mxu1 }
 0x3dc   :  { %v2207_v63 = vadd.f32 %v2206_v40, %v2205_v46  ;;  %v3717_v35 = vsel %vm1862_vm1, %v1846_v48, -1e+30 }
 0x3dd   :  { %v2208_v36 = vpop.f32.mrf.mxu1  ;;  %1903 = vmax.xlane.f32.xlu0 %v3717_v35 }
 0x3de   :  { %v1849_v39 = vadd.f32 %v2207_v63, %v3639_v53 }
 0x3df   :  { %v2209_v29 = vpop.f32.mrf.mxu1 }
 0x3e0   :  { %v2210_v56 = vadd.f32 %v2209_v29, %v2208_v36  ;;  %v3723_v5 = vsel %vm1862_vm1, %v1849_v39, -1e+30 }
 0x3e1   :  { %v2211_v49 = vpop.f32.mrf.mxu1  ;;  %1905 = vmax.xlane.f32.xlu1 %v3723_v5 }
 0x3e2   :  { %v1854_v25 = vadd.f32 %v2210_v56, %v3639_v53 }
 0x3e3   :  { %v2212_v10 = vpop.f32.mrf.mxu1 }
 0x3e4   :  { %v2213_v21 = vadd.f32 %v2212_v10, %v2211_v49  ;;  %v3729_v37 = vsel %vm1862_vm1, %v1854_v25, -1e+30 }
 0x3e5   :  { %1907 = vmax.xlane.f32.xlu0 %v3729_v37 }
 0x3e6   :  { %v1857_v22 = vadd.f32 %v2213_v21, %v3639_v53 }
 0x3e8   :  { %v3735_v60 = vsel %vm1862_vm1, %v1857_v22, -1e+30 }
 0x3e9   :  { %1909 = vmax.xlane.f32.xlu1 %v3735_v60 }
 0x436   :  { %v1880_v51 = vpop.xlane.xlu0 %1879 }
 0x437   :  { %v1911_v8 = vsub.f32 %v3645_v31, %v1880_v51 }
 0x439   :  { %v1927_v0 = vmul.f32 1.442695, %v1911_v8 }
 0x43a   :  { %v1882_v11 = vpop.xlane.xlu0 %1881 }
 0x43b   :  { %2420 = vpow2.f32 %v1927_v0  ;;  %v1912_v27 = vsub.f32 %v3651_v26, %v1882_v11 }
 0x43d   :  { %v1929_v54 = vmul.f32 1.442695, %v1912_v27 }
 0x43e   :  { %v1884_v50 = vpop.xlane.xlu1 %1883 }
 0x43f   :  { %2422 = vpow2.f32 %v1929_v54  ;;  %v1913_v43 = vsub.f32 %v3657_v23, %v1884_v50 }
 0x441   :  { %v1931_v53 = vmul.f32 1.442695, %v1913_v43 }
 0x442   :  { %v1886_v9 = vpop.xlane.xlu1 %1885 }
 0x443   :  { %2424 = vpow2.f32 %v1931_v53  ;;  %v1914_v61 = vsub.f32 %v3663_v58, %v1886_v9 }
 0x445   :  { %v1933_v3 = vmul.f32 1.442695, %v1914_v61 }
 0x446   :  { %v1888_v19 = vpop.xlane.xlu0 %1887 }
 0x447   :  { %2426 = vpow2.f32 %v1933_v3  ;;  %v1915_v31 = vsub.f32 %v3669_v44, %v1888_v19 }
 0x448   :  { %v3743_v6 = vpop.eup %2420 }
 0x449   :  { %v1935_v47 = vmul.f32 1.442695, %v1915_v31  ;;  %1959 = vadd.xlane.f32.xlu0 %v3743_v6 }
 0x44a   :  { %v1890_v26 = vpop.xlane.xlu1 %1889 }
 0x44b   :  { %2428 = vpow2.f32 %v1935_v47  ;;  %v1916_v2 = vsub.f32 %v3675_v42, %v1890_v26 }
 0x44c   :  { %v3747_v23 = vpop.eup %2422 }
 0x44d   :  { %v1937_v18 = vmul.f32 1.442695, %v1916_v2  ;;  %1961 = vadd.xlane.f32.xlu1 %v3747_v23 }
 0x44e   :  { %v1892_v58 = vpop.xlane.xlu0 %1891 }
 0x44f   :  { %2430 = vpow2.f32 %v1937_v18  ;;  %v1917_v30 = vsub.f32 %v3681_v34, %v1892_v58 }
 0x450   :  { %v3751_v4 = vpop.eup %2424 }
 0x451   :  { %v1939_v44 = vmul.f32 1.442695, %v1917_v30  ;;  %1963 = vadd.xlane.f32.xlu0 %v3751_v4 }
 0x452   :  { %v1894_v1 = vpop.xlane.xlu1 %1893 }
 0x453   :  { %2432 = vpow2.f32 %v1939_v44  ;;  %v1918_v59 = vsub.f32 %v3687_v57, %v1894_v1 }
 0x454   :  { %v3755_v33 = vpop.eup %2426 }
 0x455   :  { %v1941_v42 = vmul.f32 1.442695, %v1918_v59  ;;  %1965 = vadd.xlane.f32.xlu1 %v3755_v33 }
 0x456   :  { %v1896_v45 = vpop.xlane.xlu0 %1895 }
 0x457   :  { %2434 = vpow2.f32 %v1941_v42  ;;  %v1919_v38 = vsub.f32 %v3693_v52, %v1896_v45 }
 0x458   :  { %v3759_v32 = vpop.eup %2428 }
 0x459   :  { %v1943_v34 = vmul.f32 1.442695, %v1919_v38  ;;  %1967 = vadd.xlane.f32.xlu0 %v3759_v32 }
 0x45a   :  { %v1898_v7 = vpop.xlane.xlu1 %1897 }
 0x45b   :  { %2436 = vpow2.f32 %v1943_v34  ;;  %v1920_v12 = vsub.f32 %v3699_v15, %v1898_v7 }
 0x45c   :  { %v3763_v24 = vpop.eup %2430 }
 0x45d   :  { %v1945_v57 = vmul.f32 1.442695, %v1920_v12  ;;  %1969 = vadd.xlane.f32.xlu1 %v3763_v24 }
 0x45e   :  { %v1900_v55 = vpop.xlane.xlu0 %1899 }
 0x45f   :  { %2438 = vpow2.f32 %v1945_v57  ;;  %v1921_v28 = vsub.f32 %v3705_v62, %v1900_v55 }
 0x460   :  { %v3767_v16 = vpop.eup %2432 }
 0x461   :  { %v1947_v52 = vmul.f32 1.442695, %v1921_v28  ;;  %1971 = vadd.xlane.f32.xlu0 %v3767_v16 }
 0x462   :  { %v1902_v20 = vpop.xlane.xlu1 %1901 }
 0x463   :  { %2440 = vpow2.f32 %v1947_v52  ;;  %v1922_v14 = vsub.f32 %v3711_v13, %v1902_v20 }
 0x464   :  { %v3771_v17 = vpop.eup %2434 }
 0x465   :  { %v1949_v15 = vmul.f32 1.442695, %v1922_v14  ;;  %1973 = vadd.xlane.f32.xlu1 %v3771_v17 }
 0x466   :  { %v1904_v41 = vpop.xlane.xlu0 %1903 }
 0x467   :  { %2442 = vpow2.f32 %v1949_v15  ;;  %v1923_v46 = vsub.f32 %v3717_v35, %v1904_v41 }
 0x468   :  { %v3775_v48 = vpop.eup %2436 }
 0x469   :  { %v1951_v62 = vmul.f32 1.442695, %v1923_v46  ;;  %1975 = vadd.xlane.f32.xlu0 %v3775_v48 }
 0x46a   :  { %v1906_v40 = vpop.xlane.xlu1 %1905 }
 0x46b   :  { %2444 = vpow2.f32 %v1951_v62  ;;  %v1924_v63 = vsub.f32 %v3723_v5, %v1906_v40 }
 0x46c   :  { %v3779_v36 = vpop.eup %2438 }
 0x46d   :  { %v1953_v13 = vmul.f32 1.442695, %v1924_v63  ;;  %1977 = vadd.xlane.f32.xlu1 %v3779_v36 }
 0x46e   :  { %v1908_v39 = vpop.xlane.xlu0 %1907 }
 0x46f   :  { %2446 = vpow2.f32 %v1953_v13  ;;  %v1925_v29 = vsub.f32 %v3729_v37, %v1908_v39 }
 0x470   :  { %v3783_v56 = vpop.eup %2440 }
 0x471   :  { %v1955_v35 = vmul.f32 1.442695, %v1925_v29  ;;  %1979 = vadd.xlane.f32.xlu0 %v3783_v56 }
 0x472   :  { %v1910_v49 = vpop.xlane.xlu1 %1909 }
 0x473   :  { %2448 = vpow2.f32 %v1955_v35  ;;  %v1926_v25 = vsub.f32 %v3735_v60, %v1910_v49 }
 0x474   :  { %v3787_v10 = vpop.eup %2442 }
 0x475   :  { %v1957_v5 = vmul.f32 1.442695, %v1926_v25  ;;  %1981 = vadd.xlane.f32.xlu1 %v3787_v10 }
 0x477   :  { %2450 = vpow2.f32 %v1957_v5 }
 0x478   :  { %v3790_v21 = vpop.eup %2444 }
 0x479   :  { %1983 = vadd.xlane.f32.xlu0 %v3790_v21 }
 0x47c   :  { %v3793_v37 = vpop.eup %2446 }
 0x47d   :  { %1985 = vadd.xlane.f32.xlu1 %v3793_v37 }
 0x480   :  { %v3796_v22 = vpop.eup %2448 }
 0x481   :  { %1987 = vadd.xlane.f32.xlu0 %v3796_v22 }
 0x484   :  { %v3799_v51 = vpop.eup %2450 }
 0x485   :  { %1989 = vadd.xlane.f32.xlu1 %v3799_v51 }
 0x4d2   :  { %v1960_v60 = vpop.xlane.xlu0 %1959 }
 0x4d3   :  { %2452 = vrcp.f32 %v1960_v60 }
 0x4d6   :  { %v1962_v8 = vpop.xlane.xlu1 %1961 }
 0x4d7   :  { %2454 = vrcp.f32 %v1962_v8 }
 0x4da   :  { %v1964_v0 = vpop.xlane.xlu0 %1963 }
 0x4db   :  { %2456 = vrcp.f32 %v1964_v0 }
 0x4de   :  { %v1966_v11 = vpop.xlane.xlu1 %1965 }
 0x4df   :  { %2458 = vrcp.f32 %v1966_v11 }
 0x4e0   :  { %v2453_v27 = vpop.eup %2452 }
 0x4e1   :  { %v2007_v54 = vmul.f32 %v2453_v27, %v3743_v6 }
 0x4e2   :  { %v1968_v50 = vpop.xlane.xlu0 %1967 }
 0x4e3   :  { %2023 = vst [vmem:[%s3875_s9] sm:$0xff] %v2007_v54  ;;  %2460 = vrcp.f32 %v1968_v50 }
 0x4e4   :  { %v2455_v43 = vpop.eup %2454 }
 0x4e5   :  { %v2008_v53 = vmul.f32 %v2455_v43, %v3747_v23 }
 0x4e6   :  { %v1970_v9 = vpop.xlane.xlu1 %1969 }
 0x4e7   :  { %2024 = vst [vmem:[%s3875_s9 + $0x8] sm:$0xff] %v2008_v53  ;;  %2462 = vrcp.f32 %v1970_v9 }
 0x4e8   :  { %v2457_v61 = vpop.eup %2456 }
 0x4e9   :  { %v2009_v3 = vmul.f32 %v2457_v61, %v3751_v4 }
 0x4ea   :  { %v1972_v19 = vpop.xlane.xlu0 %1971 }
 0x4eb   :  { %2025 = vst [vmem:[%s3875_s9 + $0x10] sm:$0xff] %v2009_v3  ;;  %2464 = vrcp.f32 %v1972_v19 }
 0x4ec   :  { %v2459_v31 = vpop.eup %2458 }
 0x4ed   :  { %v2010_v6 = vmul.f32 %v2459_v31, %v3755_v33 }
 0x4ee   :  { %v1974_v47 = vpop.xlane.xlu1 %1973 }
 0x4ef   :  { %2026 = vst [vmem:[%s3875_s9 + $0x18] sm:$0xff] %v2010_v6  ;;  %2466 = vrcp.f32 %v1974_v47 }
 0x4f0   :  { %v2461_v26 = vpop.eup %2460 }
 0x4f1   :  { %v2011_v2 = vmul.f32 %v2461_v26, %v3759_v32 }
 0x4f2   :  { %v1976_v23 = vpop.xlane.xlu0 %1975 }
 0x4f3   :  { %2027 = vst [vmem:[%s3875_s9 + $0x20] sm:$0xff] %v2011_v2  ;;  %2468 = vrcp.f32 %v1976_v23 }
 0x4f4   :  { %v2463_v18 = vpop.eup %2462 }
 0x4f5   :  { %v2012_v58 = vmul.f32 %v2463_v18, %v3763_v24 }
 0x4f6   :  { %v1978_v30 = vpop.xlane.xlu1 %1977 }
 0x4f7   :  { %2028 = vst [vmem:[%s3875_s9 + $0x28] sm:$0xff] %v2012_v58  ;;  %2470 = vrcp.f32 %v1978_v30 }
 0x4f8   :  { %v2465_v4 = vpop.eup %2464 }
 0x4f9   :  { %v2013_v44 = vmul.f32 %v2465_v4, %v3767_v16 }
 0x4fa   :  { %v1980_v1 = vpop.xlane.xlu0 %1979 }
 0x4fb   :  { %2029 = vst [vmem:[%s3875_s9 + $0x30] sm:$0xff] %v2013_v44  ;;  %2472 = vrcp.f32 %v1980_v1 }
 0x4fc   :  { %v2467_v59 = vpop.eup %2466 }
 0x4fd   :  { %v2014_v33 = vmul.f32 %v2467_v59, %v3771_v17 }
 0x4fe   :  { %v1982_v42 = vpop.xlane.xlu1 %1981 }
 0x4ff   :  { %2030 = vst [vmem:[%s3875_s9 + $0x38] sm:$0xff] %v2014_v33  ;;  %2474 = vrcp.f32 %v1982_v42 }
 0x500   :  { %v2469_v45 = vpop.eup %2468 }
 0x501   :  { %v2015_v38 = vmul.f32 %v2469_v45, %v3775_v48 }
 0x502   :  { %v1984_v32 = vpop.xlane.xlu0 %1983 }
 0x503   :  { %2031 = vst [vmem:[%s3875_s9 + $0x40] sm:$0xff] %v2015_v38  ;;  %2476 = vrcp.f32 %v1984_v32 }
 0x504   :  { %v2471_v34 = vpop.eup %2470 }
 0x505   :  { %v2016_v7 = vmul.f32 %v2471_v34, %v3779_v36 }
 0x506   :  { %v1986_v12 = vpop.xlane.xlu1 %1985 }
 0x507   :  { %2032 = vst [vmem:[%s3875_s9 + $0x48] sm:$0xff] %v2016_v7  ;;  %2478 = vrcp.f32 %v1986_v12 }
 0x508   :  { %v2473_v24 = vpop.eup %2472 }
 0x509   :  { %v2017_v57 = vmul.f32 %v2473_v24, %v3783_v56 }
 0x50a   :  { %v1988_v55 = vpop.xlane.xlu0 %1987 }
 0x50b   :  { %2033 = vst [vmem:[%s3875_s9 + $0x50] sm:$0xff] %v2017_v57  ;;  %2480 = vrcp.f32 %v1988_v55 }
 0x50c   :  { %v2475_v28 = vpop.eup %2474 }
 0x50d   :  { %v2018_v16 = vmul.f32 %v2475_v28, %v3787_v10 }
 0x50e   :  { %v1990_v52 = vpop.xlane.xlu1 %1989 }
 0x50f   :  { %2034 = vst [vmem:[%s3875_s9 + $0x58] sm:$0xff] %v2018_v16  ;;  %2482 = vrcp.f32 %v1990_v52 }
 0x510   :  { %v2477_v20 = vpop.eup %2476 }
 0x511   :  { %v2019_v14 = vmul.f32 %v2477_v20, %v3790_v21 }
 0x513   :  { %2035 = vst [vmem:[%s3875_s9 + $0x60] sm:$0xff] %v2019_v14 }
 0x514   :  { %v2479_v17 = vpop.eup %2478 }
 0x515   :  { %v2020_v15 = vmul.f32 %v2479_v17, %v3793_v37 }
 0x517   :  { %2036 = vst [vmem:[%s3875_s9 + $0x68] sm:$0xff] %v2020_v15 }
 0x518   :  { %v2481_v41 = vpop.eup %2480 }
 0x519   :  { %v2021_v46 = vmul.f32 %v2481_v41, %v3796_v22 }
 0x51b   :  { %2037 = vst [vmem:[%s3875_s9 + $0x70] sm:$0xff] %v2021_v46 }
 0x51c   :  { %v2483_v48 = vpop.eup %2482 }
 0x51d   :  { %v2022_v62 = vmul.f32 %v2483_v48, %v3799_v51 }
 0x51f   :  { %2038 = vst [vmem:[%s3875_s9 + $0x78] sm:$0xff] %v2022_v62 }
 0x520   :  { %2043 = vsyncpa [#allocation3], 1 }
 0x521   :  { %2044 = vsyncpa [#allocation5], 1 }

</bundles_post_ra>
